<compile_context>
chip_gen: v7x
topology: tpu7x:2x2x1
jax: 0.10.0
libtpu: 0.0.40
codegen_flags: <defaults>
</compile_context>

<pallas_src>
import math
from functools import partial

import jax
import jax.numpy as jnp
from jax import lax
from jax.experimental import pallas as pl
from jax.experimental.pallas import tpu as pltpu

# ----------------------- tiny synthetic BERT config -----------------------
VOCAB = 128
MAX_POS = 32
TYPE_VOCAB = 2
HIDDEN = 32
N_HEADS = 2
HEAD_DIM = HIDDEN // N_HEADS
N_LAYERS = 2
FFN = 64
NUM_CLASSES = 3
LN_EPS = 1e-12
LOGIT_PAD = 128   # lane-dense logits slab width (sliced to NUM_CLASSES in JAX)
SLAB_W = 128      # lane width of the packed parameter slabs


# ------------------------- static slab layouts -----------------------------
def _round8(n):
    return -(-n // 8) * 8


def _alloc(entries):
    """entries: list of (name, rows, cols) -> dict name -> (row0, rows, cols), total rows."""
    off, r = {}, 0
    for name, nr, nc in entries:
        off[name] = (r, nr, nc)
        r += _round8(nr)                       # keep every block sublane-aligned
    return off, _round8(r)


def _w_entries():                               # bf16 matmul weights
    e = []
    for l in range(N_LAYERS):
        e += [(f"qkv_w{l}", HIDDEN, 3 * HIDDEN),
              (f"o_w{l}",   HIDDEN, HIDDEN),
              (f"f1_w{l}",  HIDDEN, FFN),
              (f"f2_w{l}",  FFN,    HIDDEN)]
    e += [("pool_w", HIDDEN, HIDDEN), ("fc_w", HIDDEN, LOGIT_PAD)]
    return e


def _p_entries():                               # f32 embeddings / biases / LN params
    e = [("word_emb", VOCAB, HIDDEN), ("pos_type", MAX_POS, HIDDEN),
         ("emb_ln_g", 1, HIDDEN), ("emb_ln_b", 1, HIDDEN)]
    for l in range(N_LAYERS):
        e += [(f"qkv_b{l}", 1, 3 * HIDDEN), (f"o_b{l}", 1, HIDDEN),
              (f"ln1_g{l}", 1, HIDDEN), (f"ln1_b{l}", 1, HIDDEN),
              (f"f1_b{l}", 1, FFN), (f"f2_b{l}", 1, HIDDEN),
              (f"ln2_g{l}", 1, HIDDEN), (f"ln2_b{l}", 1, HIDDEN)]
    e += [("pool_b", 1, HIDDEN), ("fc_b", 1, LOGIT_PAD)]
    return e


W_OFF, W_ROWS = _alloc(_w_entries())
P_OFF, P_ROWS = _alloc(_p_entries())


# ----------------------------- kernel helpers ------------------------------
def _ln(x, g, b):
    """Layernorm over last axis, f32 math."""
    mean = jnp.mean(x, axis=-1, keepdims=True)
    var = jnp.mean((x - mean) ** 2, axis=-1, keepdims=True)
    return (x - mean) * lax.rsqrt(var + LN_EPS) * g + b


def _gelu(x):
    # TODO(synk): HF BERT uses exact erf-GELU; tanh approximation used here.
    c = math.sqrt(2.0 / math.pi)
    return 0.5 * x * (1.0 + jnp.tanh(c * (x + 0.044715 * x * x * x)))


def _mm(x_f32, w_bf16):
    """bf16 MXU operands, f32 accumulation."""
    return jnp.dot(x_f32.astype(jnp.bfloat16), w_bf16,
                   preferred_element_type=jnp.float32)


# --------------------------- fused forward kernel ---------------------------
def _fused_bert_kernel(ids_ref, amask_ref, w_ref, p_ref, out_ref, ctx_ref,
                       *, batch, seq, n_heads, head_dim, n_layers):
    H = n_heads * head_dim
    M = batch * seq
    bf16 = jnp.bfloat16

    def W(name):                                   # static ref slice -> bf16 weight block
        r0, nr, nc = W_OFF[name]
        return w_ref[r0:r0 + nr, 0:nc]

    def P(name):                                   # static ref slice -> f32 param block
        r0, nr, nc = P_OFF[name]
        return p_ref[r0:r0 + nr, 0:nc]

    # ---- embeddings inside the kernel: one-hot gather on the MXU (exact f32) ----
    ids = ids_ref[...]                                             # (M, 1) int32
    iota = lax.broadcasted_iota(jnp.int32, (M, VOCAB), dimension=1)
    onehot = (iota == ids).astype(jnp.float32)                     # (M, VOCAB)
    we = jnp.dot(onehot, P("word_emb"), preferred_element_type=jnp.float32)  # (M, H)

    pt_r0, _, pt_nc = P_OFF["pos_type"]                            # pos_emb + type_emb[0]
    pt = p_ref[pt_r0:pt_r0 + seq, 0:pt_nc]                         # (S, H)
    x = (we.reshape(batch, seq, H) + pt[None, :, :]).reshape(M, H)
    x = _ln(x, P("emb_ln_g"), P("emb_ln_b"))                       # (M, H) f32

    # additive attention mask: 0 where attended, -1e4 where padded
    add_mask = (1.0 - amask_ref[...].astype(jnp.float32)) * -10000.0   # (B, S)

    for l in range(n_layers):                                      # static unrolled
        # ---- fused QKV projection: one (H, 3H) matmul (Q scale pre-folded into weights) ----
        qkv = _mm(x, W(f"qkv_w{l}")) + P(f"qkv_b{l}")              # (M, 3H) f32

        # ---- attention: per-(batch, head) outputs written straight into VMEM scratch ----
        for b in range(batch):
            r0 = b * seq
            mrow = add_mask[b:b + 1, :]                            # (1, S)
            for hd in range(n_heads):
                c0 = hd * head_dim
                q = qkv[r0:r0 + seq, c0:c0 + head_dim]             # (S, Dh), already scaled
                k = qkv[r0:r0 + seq, H + c0:H + c0 + head_dim]
                v = qkv[r0:r0 + seq, 2 * H + c0:2 * H + c0 + head_dim]
                # q @ k^T without an explicit transpose: NT contraction on the MXU
                s = lax.dot_general(q.astype(bf16), k.astype(bf16),
                                    (((1,), (1,)), ((), ())),
                                    preferred_element_type=jnp.float32)
                s = s + mrow                                       # (S, S) f32
                s = s - jnp.max(s, axis=-1, keepdims=True)
                pr = jnp.exp(s)
                pr = pr * pl.reciprocal(jnp.sum(pr, axis=-1, keepdims=True), approx=True)
                ctx_ref[r0:r0 + seq, c0:c0 + head_dim] = jnp.dot(
                    pr.astype(bf16), v.astype(bf16), preferred_element_type=jnp.float32)

        # ---- attention output projection + residual + LN ----
        attn_out = _mm(ctx_ref[...], W(f"o_w{l}")) + P(f"o_b{l}")
        x = _ln(attn_out + x, P(f"ln1_g{l}"), P(f"ln1_b{l}"))

        # ---- FFN + residual + LN ----
        ffn = _gelu(_mm(x, W(f"f1_w{l}")) + P(f"f1_b{l}"))
        ffn = _mm(ffn, W(f"f2_w{l}")) + P(f"f2_b{l}")
        x = _ln(ffn + x, P(f"ln2_g{l}"), P(f"ln2_b{l}"))

    # ---- pooler (dense + tanh on [CLS]) fused with classifier ----
    cls = x.reshape(batch, seq, H)[:, 0:1, :].reshape(batch, H)    # (B, H) CLS rows, no concat
    pooled = jnp.tanh(_mm(cls, W("pool_w")) + P("pool_b"))         # (B, H)
    # nn.Dropout(0.1): identity at inference (eval mode)
    out_ref[...] = (_mm(pooled, W("fc_w")) + P("fc_b")).astype(out_ref.dtype)   # (B, 128)


# ---------------------------- parameter packing -----------------------------
def pack_params(params):
    """Pack ALL weights into one bf16 slab and ALL f32 params into one f32 slab (done once)."""
    bf16 = jnp.bfloat16
    scale = 1.0 / math.sqrt(HEAD_DIM)

    wslab = jnp.zeros((W_ROWS, SLAB_W), bf16)
    pslab = jnp.zeros((P_ROWS, SLAB_W), jnp.float32)

    def putw(slab, name, arr):
        r0, nr, nc = W_OFF[name]
        return slab.at[r0:r0 + nr, 0:nc].set(jnp.asarray(arr, jnp.float32).astype(bf16))

    def putp(slab, name, arr):
        r0, nr, nc = P_OFF[name]
        return slab.at[r0:r0 + nr, 0:nc].set(jnp.asarray(arr, jnp.float32).reshape(nr, nc))

    for l, p in enumerate(params["layers"]):
        # fold the 1/sqrt(head_dim) attention scale into the Q projection (weight AND bias)
        qkv_w = jnp.concatenate([p["q_w"] * scale, p["k_w"], p["v_w"]], axis=1)
        qkv_b = jnp.concatenate([p["q_b"] * scale, p["k_b"], p["v_b"]])
        wslab = putw(wslab, f"qkv_w{l}", qkv_w)
        wslab = putw(wslab, f"o_w{l}", p["o_w"])
        wslab = putw(wslab, f"f1_w{l}", p["ffn1_w"])
        wslab = putw(wslab, f"f2_w{l}", p["ffn2_w"])
        pslab = putp(pslab, f"qkv_b{l}", qkv_b)
        pslab = putp(pslab, f"o_b{l}", p["o_b"])
        pslab = putp(pslab, f"ln1_g{l}", p["ln1_g"])
        pslab = putp(pslab, f"ln1_b{l}", p["ln1_b"])
        pslab = putp(pslab, f"f1_b{l}", p["ffn1_b"])
        pslab = putp(pslab, f"f2_b{l}", p["ffn2_b"])
        pslab = putp(pslab, f"ln2_g{l}", p["ln2_g"])
        pslab = putp(pslab, f"ln2_b{l}", p["ln2_b"])

    wslab = putw(wslab, "pool_w", params["pooler_w"])
    fc_w_pad = jnp.zeros((HIDDEN, LOGIT_PAD), jnp.float32).at[:, :NUM_CLASSES].set(params["fc_w"])
    wslab = putw(wslab, "fc_w", fc_w_pad)

    pslab = putp(pslab, "word_emb", params["word_emb"])
    # TODO(synk): token_type_ids hard-coded to segment 0 (single-segment inputs).
    pslab = putp(pslab, "pos_type", params["pos_emb"] + params["type_emb"][0][None, :])
    pslab = putp(pslab, "emb_ln_g", params["emb_ln_g"])
    pslab = putp(pslab, "emb_ln_b", params["emb_ln_b"])
    pslab = putp(pslab, "pool_b", params["pooler_b"])
    fc_b_pad = jnp.zeros((LOGIT_PAD,), jnp.float32).at[:NUM_CLASSES].set(params["fc_b"])
    pslab = putp(pslab, "fc_b", fc_b_pad)
    return wslab, pslab


# ------------------------------ model forward ------------------------------
def bert_classifier_forward(wslab, pslab, input_ids, attention_mask):
    B, S = input_ids.shape
    M = B * S

    ids2d = input_ids.reshape(M, 1).astype(jnp.int32)     # (M, 1) for in-kernel one-hot gather
    amask = attention_mask.astype(jnp.int32)               # (B, S)

    # advisory cost estimate for XLA scheduling
    flops = (2 * M * VOCAB * HIDDEN
             + N_LAYERS * (2 * M * HIDDEN * (3 * HIDDEN) + 2 * M * HIDDEN * HIDDEN
                           + 4 * M * HIDDEN * FFN
                           + 4 * B * N_HEADS * S * S * HEAD_DIM)
             + 2 * B * HIDDEN * HIDDEN + 2 * B * HIDDEN * LOGIT_PAD)
    transcendentals = (N_LAYERS * (B * N_HEADS * S * S + M * FFN)
                       + B * HIDDEN + (2 * N_LAYERS + 1) * M)
    bytes_accessed = (M * 4 + B * S * 4
                      + W_ROWS * SLAB_W * 2 + P_ROWS * SLAB_W * 4
                      + B * LOGIT_PAD * 4)

    kernel = partial(_fused_bert_kernel, batch=B, seq=S, n_heads=N_HEADS,
                     head_dim=HEAD_DIM, n_layers=N_LAYERS)

    logits_pad = pl.pallas_call(
        kernel,
        out_shape=jax.ShapeDtypeStruct((B, LOGIT_PAD), jnp.float32),
        scratch_shapes=[pltpu.VMEM((M, HIDDEN), jnp.float32)],   # attention ctx scratch
        cost_estimate=pl.CostEstimate(flops=flops,
                                      transcendentals=transcendentals,
                                      bytes_accessed=bytes_accessed),
    )(ids2d, amask, wslab, pslab)

    return logits_pad[:, :NUM_CLASSES]


# --------------------------- deterministic params ---------------------------
def init_params(key):
    # TODO(synk): pretrained HF BertModel weights are not loadable here; synthetic small-BERT init.
    keys = jax.random.split(key, 5)

    def w(k, shape):
        return jax.random.normal(k, shape, jnp.float32) * 0.02

    params = {
        "word_emb": w(keys[0], (VOCAB, HIDDEN)),
        "pos_emb": w(keys[1], (MAX_POS, HIDDEN)),
        "type_emb": w(keys[2], (TYPE_VOCAB, HIDDEN)),
        "emb_ln_g": jnp.ones((HIDDEN,), jnp.float32),
        "emb_ln_b": jnp.zeros((HIDDEN,), jnp.float32),
        "pooler_w": w(keys[3], (HIDDEN, HIDDEN)),
        "pooler_b": jnp.zeros((HIDDEN,), jnp.float32),
        "fc_w": w(keys[4], (HIDDEN, NUM_CLASSES)),
        "fc_b": jnp.zeros((NUM_CLASSES,), jnp.float32),
        "layers": [],
    }
    for li in range(N_LAYERS):
        lk = jax.random.split(jax.random.fold_in(key, 100 + li), 6)
        params["layers"].append({
            "q_w": w(lk[0], (HIDDEN, HIDDEN)), "q_b": jnp.zeros((HIDDEN,), jnp.float32),
            "k_w": w(lk[1], (HIDDEN, HIDDEN)), "k_b": jnp.zeros((HIDDEN,), jnp.float32),
            "v_w": w(lk[2], (HIDDEN, HIDDEN)), "v_b": jnp.zeros((HIDDEN,), jnp.float32),
            "o_w": w(lk[3], (HIDDEN, HIDDEN)), "o_b": jnp.zeros((HIDDEN,), jnp.float32),
            "ln1_g": jnp.ones((HIDDEN,), jnp.float32), "ln1_b": jnp.zeros((HIDDEN,), jnp.float32),
            "ffn1_w": w(lk[4], (HIDDEN, FFN)), "ffn1_b": jnp.zeros((FFN,), jnp.float32),
            "ffn2_w": w(lk[5], (FFN, HIDDEN)), "ffn2_b": jnp.zeros((HIDDEN,), jnp.float32),
            "ln2_g": jnp.ones((HIDDEN,), jnp.float32), "ln2_b": jnp.zeros((HIDDEN,), jnp.float32),
        })
    return params


# ---------------------------------- main ----------------------------------
if __name__ == "__main__":
    B, S = 2, 8
    key = jax.random.PRNGKey(0)
    pkey, ikey = jax.random.split(key)

    params = init_params(pkey)
    wslab, pslab = pack_params(params)          # pack once, outside the per-call path
    input_ids = jax.random.randint(ikey, (B, S), 0, VOCAB, dtype=jnp.int32)
    attention_mask = jnp.array([[1] * S, [1] * (S - 3) + [0] * 3], dtype=jnp.int32)

    fwd = jax.jit(bert_classifier_forward)
    logits = fwd(wslab, pslab, input_ids, attention_mask)
    logits = jax.block_until_ready(logits)

    assert logits.shape == (B, NUM_CLASSES)
    assert bool(jnp.all(jnp.isfinite(logits)))
    print("KERNEL_OK")
</pallas_src>

<mosaic_0001>
module attributes {stable_mosaic.version = 11 : i64} {
  func.func @_fused_bert_kernel(%arg0: memref<16x1xi32, #tpu.memory_space<vmem>>, %arg1: memref<2x8xi32, #tpu.memory_space<vmem>>, %arg2: memref<384x128xbf16, #tpu.memory_space<vmem>>, %arg3: memref<320x128xf32, #tpu.memory_space<vmem>>, %arg4: memref<2x128xf32, #tpu.memory_space<vmem>>, %arg5: memref<16x32xf32, #tpu.memory_space<vmem>>) attributes {dimension_semantics = [], scalar_prefetch = 0 : i64, scratch_operands = 1 : i64, tpu.core_type = #tpu.core_type<tc>} {
    %c0 = arith.constant 0 : index
    %c0_0 = arith.constant 0 : index
    %0 = vector.load %arg0[%c0, %c0_0] : memref<16x1xi32, #tpu.memory_space<vmem>>, vector<16x1xi32>
    %1 = tpu.iota {dimensions = array<i32: 1>} : vector<16x128xi32>
    %2 = vector.broadcast %0 : vector<16x1xi32> to vector<16x128xi32>
    %3 = arith.cmpi eq, %1, %2 : vector<16x128xi32>
    %4 = arith.extui %3 : vector<16x128xi1> to vector<16x128xi32>
    %5 = arith.sitofp %4 : vector<16x128xi32> to vector<16x128xf32>
    %c0_1 = arith.constant 0 : index
    %c0_2 = arith.constant 0 : index
    %6 = vector.load %arg3[%c0_1, %c0_2] : memref<320x128xf32, #tpu.memory_space<vmem>>, vector<128x32xf32>
    %cst = arith.constant dense<0.000000e+00> : vector<16x32xf32>
    %7 = tpu.matmul %5, %6, %cst {dimension_numbers = #tpu.dot_dimension_numbers<[1], [0], [0], [1], [0, 0, 1, 1], [], []>} : vector<16x128xf32>, vector<128x32xf32>, vector<16x32xf32> -> vector<16x32xf32>
    %c128 = arith.constant 128 : index
    %c0_3 = arith.constant 0 : index
    %8 = vector.load %arg3[%c128, %c0_3] : memref<320x128xf32, #tpu.memory_space<vmem>>, vector<8x32xf32>
    %9 = vector.shape_cast %7 : vector<16x32xf32> to vector<2x8x32xf32>
    %10 = vector.shape_cast %8 : vector<8x32xf32> to vector<1x8x32xf32>
    %11 = vector.broadcast %10 : vector<1x8x32xf32> to vector<2x8x32xf32>
    %12 = arith.addf %9, %11 : vector<2x8x32xf32>
    %13 = vector.shape_cast %12 : vector<2x8x32xf32> to vector<16x32xf32>
    %c160 = arith.constant 160 : index
    %c0_4 = arith.constant 0 : index
    %14 = vector.load %arg3[%c160, %c0_4] : memref<320x128xf32, #tpu.memory_space<vmem>>, vector<1x32xf32>
    %c168 = arith.constant 168 : index
    %c0_5 = arith.constant 0 : index
    %15 = vector.load %arg3[%c168, %c0_5] : memref<320x128xf32, #tpu.memory_space<vmem>>, vector<1x32xf32>
    %cst_6 = arith.constant dense<0.000000e+00> : vector<16xf32>
    %16 = vector.multi_reduction <add>, %13, %cst_6 [1] : vector<16x32xf32> to vector<16xf32>
    %17 = vector.shape_cast %16 : vector<16xf32> to vector<16x1xf32>
    %cst_7 = arith.constant 3.200000e+01 : f32
    %18 = vector.broadcast %cst_7 : f32 to vector<16x1xf32>
    %19 = arith.divf %17, %18 : vector<16x1xf32>
    %20 = vector.broadcast %19 : vector<16x1xf32> to vector<16x32xf32>
    %21 = arith.subf %13, %20 : vector<16x32xf32>
    %22 = arith.mulf %21, %21 : vector<16x32xf32>
    %cst_8 = arith.constant dense<0.000000e+00> : vector<16xf32>
    %23 = vector.multi_reduction <add>, %22, %cst_8 [1] : vector<16x32xf32> to vector<16xf32>
    %24 = vector.shape_cast %23 : vector<16xf32> to vector<16x1xf32>
    %cst_9 = arith.constant 3.200000e+01 : f32
    %25 = vector.broadcast %cst_9 : f32 to vector<16x1xf32>
    %26 = arith.divf %24, %25 : vector<16x1xf32>
    %27 = vector.broadcast %19 : vector<16x1xf32> to vector<16x32xf32>
    %28 = arith.subf %13, %27 : vector<16x32xf32>
    %cst_10 = arith.constant 9.99999996E-13 : f32
    %29 = vector.broadcast %cst_10 : f32 to vector<16x1xf32>
    %30 = arith.addf %26, %29 : vector<16x1xf32>
    %31 = math.rsqrt %30 : vector<16x1xf32>
    %32 = vector.broadcast %31 : vector<16x1xf32> to vector<16x32xf32>
    %33 = arith.mulf %28, %32 : vector<16x32xf32>
    %34 = vector.broadcast %14 : vector<1x32xf32> to vector<16x32xf32>
    %35 = arith.mulf %33, %34 : vector<16x32xf32>
    %36 = vector.broadcast %15 : vector<1x32xf32> to vector<16x32xf32>
    %37 = arith.addf %35, %36 : vector<16x32xf32>
    %c0_11 = arith.constant 0 : index
    %c0_12 = arith.constant 0 : index
    %38 = vector.load %arg1[%c0_11, %c0_12] : memref<2x8xi32, #tpu.memory_space<vmem>>, vector<2x8xi32>
    %39 = arith.sitofp %38 : vector<2x8xi32> to vector<2x8xf32>
    %cst_13 = arith.constant 1.000000e+00 : f32
    %40 = vector.broadcast %cst_13 : f32 to vector<2x8xf32>
    %41 = arith.subf %40, %39 : vector<2x8xf32>
    %cst_14 = arith.constant -1.000000e+04 : f32
    %42 = vector.broadcast %cst_14 : f32 to vector<2x8xf32>
    %43 = arith.mulf %41, %42 : vector<2x8xf32>
    %c0_15 = arith.constant 0 : index
    %c0_16 = arith.constant 0 : index
    %44 = vector.load %arg2[%c0_15, %c0_16] : memref<384x128xbf16, #tpu.memory_space<vmem>>, vector<32x96xbf16>
    %45 = arith.truncf %37 : vector<16x32xf32> to vector<16x32xbf16>
    %cst_17 = arith.constant dense<0.000000e+00> : vector<16x96xf32>
    %46 = tpu.matmul %45, %44, %cst_17 {dimension_numbers = #tpu.dot_dimension_numbers<[1], [0], [0], [1], [0, 0, 1, 1], [], []>} : vector<16x32xbf16>, vector<32x96xbf16>, vector<16x96xf32> -> vector<16x96xf32>
    %c176 = arith.constant 176 : index
    %c0_18 = arith.constant 0 : index
    %47 = vector.load %arg3[%c176, %c0_18] : memref<320x128xf32, #tpu.memory_space<vmem>>, vector<1x96xf32>
    %48 = vector.broadcast %47 : vector<1x96xf32> to vector<16x96xf32>
    %49 = arith.addf %46, %48 : vector<16x96xf32>
    %50 = vector.extract_strided_slice %43 {offsets = [0, 0], sizes = [1, 8], strides = [1, 1]} : vector<2x8xf32> to vector<1x8xf32>
    %51 = vector.extract_strided_slice %49 {offsets = [0, 0], sizes = [8, 16], strides = [1, 1]} : vector<16x96xf32> to vector<8x16xf32>
    %52 = vector.extract_strided_slice %49 {offsets = [0, 32], sizes = [8, 16], strides = [1, 1]} : vector<16x96xf32> to vector<8x16xf32>
    %53 = vector.extract_strided_slice %49 {offsets = [0, 64], sizes = [8, 16], strides = [1, 1]} : vector<16x96xf32> to vector<8x16xf32>
    %54 = arith.truncf %51 : vector<8x16xf32> to vector<8x16xbf16>
    %55 = arith.truncf %52 : vector<8x16xf32> to vector<8x16xbf16>
    %cst_19 = arith.constant dense<0.000000e+00> : vector<8x8xf32>
    %56 = tpu.matmul %54, %55, %cst_19 {dimension_numbers = #tpu.dot_dimension_numbers<[1], [1], [0], [0], [0, 0, 1, 0], [], []>} : vector<8x16xbf16>, vector<8x16xbf16>, vector<8x8xf32> -> vector<8x8xf32>
    %57 = vector.broadcast %50 : vector<1x8xf32> to vector<8x8xf32>
    %58 = arith.addf %56, %57 : vector<8x8xf32>
    %cst_20 = arith.constant dense<0xFF800000> : vector<8xf32>
    %59 = vector.multi_reduction <maximumf>, %58, %cst_20 [1] : vector<8x8xf32> to vector<8xf32>
    %60 = vector.shape_cast %59 : vector<8xf32> to vector<8x1xf32>
    %61 = vector.broadcast %60 : vector<8x1xf32> to vector<8x8xf32>
    %62 = arith.subf %58, %61 : vector<8x8xf32>
    %63 = math.exp %62 : vector<8x8xf32>
    %cst_21 = arith.constant dense<0.000000e+00> : vector<8xf32>
    %64 = vector.multi_reduction <add>, %63, %cst_21 [1] : vector<8x8xf32> to vector<8xf32>
    %65 = vector.shape_cast %64 : vector<8xf32> to vector<8x1xf32>
    %66 = tpu.reciprocal %65 {approx = true} : vector<8x1xf32> -> vector<8x1xf32>
    %67 = vector.broadcast %66 : vector<8x1xf32> to vector<8x8xf32>
    %68 = arith.mulf %63, %67 : vector<8x8xf32>
    %69 = arith.truncf %68 : vector<8x8xf32> to vector<8x8xbf16>
    %70 = arith.truncf %53 : vector<8x16xf32> to vector<8x16xbf16>
    %cst_22 = arith.constant dense<0.000000e+00> : vector<8x16xf32>
    %71 = tpu.matmul %69, %70, %cst_22 {dimension_numbers = #tpu.dot_dimension_numbers<[1], [0], [0], [1], [0, 0, 1, 1], [], []>} : vector<8x8xbf16>, vector<8x16xbf16>, vector<8x16xf32> -> vector<8x16xf32>
    %c0_23 = arith.constant 0 : index
    %c0_24 = arith.constant 0 : index
    %72 = vector.load %arg5[%c0_23, %c0_24] : memref<16x32xf32, #tpu.memory_space<vmem>>, vector<8x16xf32>
    tpu.vector_store %arg5[%c0_23, %c0_24], %71 {strides = array<i32>} : memref<16x32xf32, #tpu.memory_space<vmem>>, vector<8x16xf32>,
    %73 = vector.extract_strided_slice %49 {offsets = [0, 16], sizes = [8, 16], strides = [1, 1]} : vector<16x96xf32> to vector<8x16xf32>
    %74 = vector.extract_strided_slice %49 {offsets = [0, 48], sizes = [8, 16], strides = [1, 1]} : vector<16x96xf32> to vector<8x16xf32>
    %75 = vector.extract_strided_slice %49 {offsets = [0, 80], sizes = [8, 16], strides = [1, 1]} : vector<16x96xf32> to vector<8x16xf32>
    %76 = arith.truncf %73 : vector<8x16xf32> to vector<8x16xbf16>
    %77 = arith.truncf %74 : vector<8x16xf32> to vector<8x16xbf16>
    %cst_25 = arith.constant dense<0.000000e+00> : vector<8x8xf32>
    %78 = tpu.matmul %76, %77, %cst_25 {dimension_numbers = #tpu.dot_dimension_numbers<[1], [1], [0], [0], [0, 0, 1, 0], [], []>} : vector<8x16xbf16>, vector<8x16xbf16>, vector<8x8xf32> -> vector<8x8xf32>
    %79 = vector.broadcast %50 : vector<1x8xf32> to vector<8x8xf32>
    %80 = arith.addf %78, %79 : vector<8x8xf32>
    %cst_26 = arith.constant dense<0xFF800000> : vector<8xf32>
    %81 = vector.multi_reduction <maximumf>, %80, %cst_26 [1] : vector<8x8xf32> to vector<8xf32>
    %82 = vector.shape_cast %81 : vector<8xf32> to vector<8x1xf32>
    %83 = vector.broadcast %82 : vector<8x1xf32> to vector<8x8xf32>
    %84 = arith.subf %80, %83 : vector<8x8xf32>
    %85 = math.exp %84 : vector<8x8xf32>
    %cst_27 = arith.constant dense<0.000000e+00> : vector<8xf32>
    %86 = vector.multi_reduction <add>, %85, %cst_27 [1] : vector<8x8xf32> to vector<8xf32>
    %87 = vector.shape_cast %86 : vector<8xf32> to vector<8x1xf32>
    %88 = tpu.reciprocal %87 {approx = true} : vector<8x1xf32> -> vector<8x1xf32>
    %89 = vector.broadcast %88 : vector<8x1xf32> to vector<8x8xf32>
    %90 = arith.mulf %85, %89 : vector<8x8xf32>
    %91 = arith.truncf %90 : vector<8x8xf32> to vector<8x8xbf16>
    %92 = arith.truncf %75 : vector<8x16xf32> to vector<8x16xbf16>
    %cst_28 = arith.constant dense<0.000000e+00> : vector<8x16xf32>
    %93 = tpu.matmul %91, %92, %cst_28 {dimension_numbers = #tpu.dot_dimension_numbers<[1], [0], [0], [1], [0, 0, 1, 1], [], []>} : vector<8x8xbf16>, vector<8x16xbf16>, vector<8x16xf32> -> vector<8x16xf32>
    %c0_29 = arith.constant 0 : index
    %c16 = arith.constant 16 : index
    %94 = vector.load %arg5[%c0_29, %c16] : memref<16x32xf32, #tpu.memory_space<vmem>>, vector<8x16xf32>
    tpu.vector_store %arg5[%c0_29, %c16], %93 {strides = array<i32>} : memref<16x32xf32, #tpu.memory_space<vmem>>, vector<8x16xf32>,
    %95 = vector.extract_strided_slice %43 {offsets = [1, 0], sizes = [1, 8], strides = [1, 1]} : vector<2x8xf32> to vector<1x8xf32>
    %96 = vector.extract_strided_slice %49 {offsets = [8, 0], sizes = [8, 16], strides = [1, 1]} : vector<16x96xf32> to vector<8x16xf32>
    %97 = vector.extract_strided_slice %49 {offsets = [8, 32], sizes = [8, 16], strides = [1, 1]} : vector<16x96xf32> to vector<8x16xf32>
    %98 = vector.extract_strided_slice %49 {offsets = [8, 64], sizes = [8, 16], strides = [1, 1]} : vector<16x96xf32> to vector<8x16xf32>
    %99 = arith.truncf %96 : vector<8x16xf32> to vector<8x16xbf16>
    %100 = arith.truncf %97 : vector<8x16xf32> to vector<8x16xbf16>
    %cst_30 = arith.constant dense<0.000000e+00> : vector<8x8xf32>
    %101 = tpu.matmul %99, %100, %cst_30 {dimension_numbers = #tpu.dot_dimension_numbers<[1], [1], [0], [0], [0, 0, 1, 0], [], []>} : vector<8x16xbf16>, vector<8x16xbf16>, vector<8x8xf32> -> vector<8x8xf32>
    %102 = vector.broadcast %95 : vector<1x8xf32> to vector<8x8xf32>
    %103 = arith.addf %101, %102 : vector<8x8xf32>
    %cst_31 = arith.constant dense<0xFF800000> : vector<8xf32>
    %104 = vector.multi_reduction <maximumf>, %103, %cst_31 [1] : vector<8x8xf32> to vector<8xf32>
    %105 = vector.shape_cast %104 : vector<8xf32> to vector<8x1xf32>
    %106 = vector.broadcast %105 : vector<8x1xf32> to vector<8x8xf32>
    %107 = arith.subf %103, %106 : vector<8x8xf32>
    %108 = math.exp %107 : vector<8x8xf32>
    %cst_32 = arith.constant dense<0.000000e+00> : vector<8xf32>
    %109 = vector.multi_reduction <add>, %108, %cst_32 [1] : vector<8x8xf32> to vector<8xf32>
    %110 = vector.shape_cast %109 : vector<8xf32> to vector<8x1xf32>
    %111 = tpu.reciprocal %110 {approx = true} : vector<8x1xf32> -> vector<8x1xf32>
    %112 = vector.broadcast %111 : vector<8x1xf32> to vector<8x8xf32>
    %113 = arith.mulf %108, %112 : vector<8x8xf32>
    %114 = arith.truncf %113 : vector<8x8xf32> to vector<8x8xbf16>
    %115 = arith.truncf %98 : vector<8x16xf32> to vector<8x16xbf16>
    %cst_33 = arith.constant dense<0.000000e+00> : vector<8x16xf32>
    %116 = tpu.matmul %114, %115, %cst_33 {dimension_numbers = #tpu.dot_dimension_numbers<[1], [0], [0], [1], [0, 0, 1, 1], [], []>} : vector<8x8xbf16>, vector<8x16xbf16>, vector<8x16xf32> -> vector<8x16xf32>
    %c8 = arith.constant 8 : index
    %c0_34 = arith.constant 0 : index
    %117 = vector.load %arg5[%c8, %c0_34] : memref<16x32xf32, #tpu.memory_space<vmem>>, vector<8x16xf32>
    tpu.vector_store %arg5[%c8, %c0_34], %116 {strides = array<i32>} : memref<16x32xf32, #tpu.memory_space<vmem>>, vector<8x16xf32>,
    %118 = vector.extract_strided_slice %49 {offsets = [8, 16], sizes = [8, 16], strides = [1, 1]} : vector<16x96xf32> to vector<8x16xf32>
    %119 = vector.extract_strided_slice %49 {offsets = [8, 48], sizes = [8, 16], strides = [1, 1]} : vector<16x96xf32> to vector<8x16xf32>
    %120 = vector.extract_strided_slice %49 {offsets = [8, 80], sizes = [8, 16], strides = [1, 1]} : vector<16x96xf32> to vector<8x16xf32>
    %121 = arith.truncf %118 : vector<8x16xf32> to vector<8x16xbf16>
    %122 = arith.truncf %119 : vector<8x16xf32> to vector<8x16xbf16>
    %cst_35 = arith.constant dense<0.000000e+00> : vector<8x8xf32>
    %123 = tpu.matmul %121, %122, %cst_35 {dimension_numbers = #tpu.dot_dimension_numbers<[1], [1], [0], [0], [0, 0, 1, 0], [], []>} : vector<8x16xbf16>, vector<8x16xbf16>, vector<8x8xf32> -> vector<8x8xf32>
    %124 = vector.broadcast %95 : vector<1x8xf32> to vector<8x8xf32>
    %125 = arith.addf %123, %124 : vector<8x8xf32>
    %cst_36 = arith.constant dense<0xFF800000> : vector<8xf32>
    %126 = vector.multi_reduction <maximumf>, %125, %cst_36 [1] : vector<8x8xf32> to vector<8xf32>
    %127 = vector.shape_cast %126 : vector<8xf32> to vector<8x1xf32>
    %128 = vector.broadcast %127 : vector<8x1xf32> to vector<8x8xf32>
    %129 = arith.subf %125, %128 : vector<8x8xf32>
    %130 = math.exp %129 : vector<8x8xf32>
    %cst_37 = arith.constant dense<0.000000e+00> : vector<8xf32>
    %131 = vector.multi_reduction <add>, %130, %cst_37 [1] : vector<8x8xf32> to vector<8xf32>
    %132 = vector.shape_cast %131 : vector<8xf32> to vector<8x1xf32>
    %133 = tpu.reciprocal %132 {approx = true} : vector<8x1xf32> -> vector<8x1xf32>
    %134 = vector.broadcast %133 : vector<8x1xf32> to vector<8x8xf32>
    %135 = arith.mulf %130, %134 : vector<8x8xf32>
    %136 = arith.truncf %135 : vector<8x8xf32> to vector<8x8xbf16>
    %137 = arith.truncf %120 : vector<8x16xf32> to vector<8x16xbf16>
    %cst_38 = arith.constant dense<0.000000e+00> : vector<8x16xf32>
    %138 = tpu.matmul %136, %137, %cst_38 {dimension_numbers = #tpu.dot_dimension_numbers<[1], [0], [0], [1], [0, 0, 1, 1], [], []>} : vector<8x8xbf16>, vector<8x16xbf16>, vector<8x16xf32> -> vector<8x16xf32>
    %c8_39 = arith.constant 8 : index
    %c16_40 = arith.constant 16 : index
    %139 = vector.load %arg5[%c8_39, %c16_40] : memref<16x32xf32, #tpu.memory_space<vmem>>, vector<8x16xf32>
    tpu.vector_store %arg5[%c8_39, %c16_40], %138 {strides = array<i32>} : memref<16x32xf32, #tpu.memory_space<vmem>>, vector<8x16xf32>,
    %c0_41 = arith.constant 0 : index
    %c0_42 = arith.constant 0 : index
    %140 = vector.load %arg5[%c0_41, %c0_42] : memref<16x32xf32, #tpu.memory_space<vmem>>, vector<16x32xf32>
    %c32 = arith.constant 32 : index
    %c0_43 = arith.constant 0 : index
    %141 = vector.load %arg2[%c32, %c0_43] : memref<384x128xbf16, #tpu.memory_space<vmem>>, vector<32x32xbf16>
    %142 = arith.truncf %140 : vector<16x32xf32> to vector<16x32xbf16>
    %cst_44 = arith.constant dense<0.000000e+00> : vector<16x32xf32>
    %143 = tpu.matmul %142, %141, %cst_44 {dimension_numbers = #tpu.dot_dimension_numbers<[1], [0], [0], [1], [0, 0, 1, 1], [], []>} : vector<16x32xbf16>, vector<32x32xbf16>, vector<16x32xf32> -> vector<16x32xf32>
    %c184 = arith.constant 184 : index
    %c0_45 = arith.constant 0 : index
    %144 = vector.load %arg3[%c184, %c0_45] : memref<320x128xf32, #tpu.memory_space<vmem>>, vector<1x32xf32>
    %145 = vector.broadcast %144 : vector<1x32xf32> to vector<16x32xf32>
    %146 = arith.addf %143, %145 : vector<16x32xf32>
    %147 = arith.addf %146, %37 : vector<16x32xf32>
    %c192 = arith.constant 192 : index
    %c0_46 = arith.constant 0 : index
    %148 = vector.load %arg3[%c192, %c0_46] : memref<320x128xf32, #tpu.memory_space<vmem>>, vector<1x32xf32>
    %c200 = arith.constant 200 : index
    %c0_47 = arith.constant 0 : index
    %149 = vector.load %arg3[%c200, %c0_47] : memref<320x128xf32, #tpu.memory_space<vmem>>, vector<1x32xf32>
    %cst_48 = arith.constant dense<0.000000e+00> : vector<16xf32>
    %150 = vector.multi_reduction <add>, %147, %cst_48 [1] : vector<16x32xf32> to vector<16xf32>
    %151 = vector.shape_cast %150 : vector<16xf32> to vector<16x1xf32>
    %cst_49 = arith.constant 3.200000e+01 : f32
    %152 = vector.broadcast %cst_49 : f32 to vector<16x1xf32>
    %153 = arith.divf %151, %152 : vector<16x1xf32>
    %154 = vector.broadcast %153 : vector<16x1xf32> to vector<16x32xf32>
    %155 = arith.subf %147, %154 : vector<16x32xf32>
    %156 = arith.mulf %155, %155 : vector<16x32xf32>
    %cst_50 = arith.constant dense<0.000000e+00> : vector<16xf32>
    %157 = vector.multi_reduction <add>, %156, %cst_50 [1] : vector<16x32xf32> to vector<16xf32>
    %158 = vector.shape_cast %157 : vector<16xf32> to vector<16x1xf32>
    %cst_51 = arith.constant 3.200000e+01 : f32
    %159 = vector.broadcast %cst_51 : f32 to vector<16x1xf32>
    %160 = arith.divf %158, %159 : vector<16x1xf32>
    %161 = vector.broadcast %153 : vector<16x1xf32> to vector<16x32xf32>
    %162 = arith.subf %147, %161 : vector<16x32xf32>
    %cst_52 = arith.constant 9.99999996E-13 : f32
    %163 = vector.broadcast %cst_52 : f32 to vector<16x1xf32>
    %164 = arith.addf %160, %163 : vector<16x1xf32>
    %165 = math.rsqrt %164 : vector<16x1xf32>
    %166 = vector.broadcast %165 : vector<16x1xf32> to vector<16x32xf32>
    %167 = arith.mulf %162, %166 : vector<16x32xf32>
    %168 = vector.broadcast %148 : vector<1x32xf32> to vector<16x32xf32>
    %169 = arith.mulf %167, %168 : vector<16x32xf32>
    %170 = vector.broadcast %149 : vector<1x32xf32> to vector<16x32xf32>
    %171 = arith.addf %169, %170 : vector<16x32xf32>
    %c64 = arith.constant 64 : index
    %c0_53 = arith.constant 0 : index
    %172 = vector.load %arg2[%c64, %c0_53] : memref<384x128xbf16, #tpu.memory_space<vmem>>, vector<32x64xbf16>
    %173 = arith.truncf %171 : vector<16x32xf32> to vector<16x32xbf16>
    %cst_54 = arith.constant dense<0.000000e+00> : vector<16x64xf32>
    %174 = tpu.matmul %173, %172, %cst_54 {dimension_numbers = #tpu.dot_dimension_numbers<[1], [0], [0], [1], [0, 0, 1, 1], [], []>} : vector<16x32xbf16>, vector<32x64xbf16>, vector<16x64xf32> -> vector<16x64xf32>
    %c208 = arith.constant 208 : index
    %c0_55 = arith.constant 0 : index
    %175 = vector.load %arg3[%c208, %c0_55] : memref<320x128xf32, #tpu.memory_space<vmem>>, vector<1x64xf32>
    %176 = vector.broadcast %175 : vector<1x64xf32> to vector<16x64xf32>
    %177 = arith.addf %174, %176 : vector<16x64xf32>
    %cst_56 = arith.constant 5.000000e-01 : f32
    %178 = vector.broadcast %cst_56 : f32 to vector<16x64xf32>
    %179 = arith.mulf %178, %177 : vector<16x64xf32>
    %cst_57 = arith.constant 4.471500e-02 : f32
    %180 = vector.broadcast %cst_57 : f32 to vector<16x64xf32>
    %181 = arith.mulf %180, %177 : vector<16x64xf32>
    %182 = arith.mulf %181, %177 : vector<16x64xf32>
    %183 = arith.mulf %182, %177 : vector<16x64xf32>
    %184 = arith.addf %177, %183 : vector<16x64xf32>
    %cst_58 = arith.constant 0.797884583 : f32
    %185 = vector.broadcast %cst_58 : f32 to vector<16x64xf32>
    %186 = arith.mulf %185, %184 : vector<16x64xf32>
    %187 = math.tanh %186 : vector<16x64xf32>
    %cst_59 = arith.constant 1.000000e+00 : f32
    %188 = vector.broadcast %cst_59 : f32 to vector<16x64xf32>
    %189 = arith.addf %188, %187 : vector<16x64xf32>
    %190 = arith.mulf %179, %189 : vector<16x64xf32>
    %c96 = arith.constant 96 : index
    %c0_60 = arith.constant 0 : index
    %191 = vector.load %arg2[%c96, %c0_60] : memref<384x128xbf16, #tpu.memory_space<vmem>>, vector<64x32xbf16>
    %192 = arith.truncf %190 : vector<16x64xf32> to vector<16x64xbf16>
    %cst_61 = arith.constant dense<0.000000e+00> : vector<16x32xf32>
    %193 = tpu.matmul %192, %191, %cst_61 {dimension_numbers = #tpu.dot_dimension_numbers<[1], [0], [0], [1], [0, 0, 1, 1], [], []>} : vector<16x64xbf16>, vector<64x32xbf16>, vector<16x32xf32> -> vector<16x32xf32>
    %c216 = arith.constant 216 : index
    %c0_62 = arith.constant 0 : index
    %194 = vector.load %arg3[%c216, %c0_62] : memref<320x128xf32, #tpu.memory_space<vmem>>, vector<1x32xf32>
    %195 = vector.broadcast %194 : vector<1x32xf32> to vector<16x32xf32>
    %196 = arith.addf %193, %195 : vector<16x32xf32>
    %197 = arith.addf %196, %171 : vector<16x32xf32>
    %c224 = arith.constant 224 : index
    %c0_63 = arith.constant 0 : index
    %198 = vector.load %arg3[%c224, %c0_63] : memref<320x128xf32, #tpu.memory_space<vmem>>, vector<1x32xf32>
    %c232 = arith.constant 232 : index
    %c0_64 = arith.constant 0 : index
    %199 = vector.load %arg3[%c232, %c0_64] : memref<320x128xf32, #tpu.memory_space<vmem>>, vector<1x32xf32>
    %cst_65 = arith.constant dense<0.000000e+00> : vector<16xf32>
    %200 = vector.multi_reduction <add>, %197, %cst_65 [1] : vector<16x32xf32> to vector<16xf32>
    %201 = vector.shape_cast %200 : vector<16xf32> to vector<16x1xf32>
    %cst_66 = arith.constant 3.200000e+01 : f32
    %202 = vector.broadcast %cst_66 : f32 to vector<16x1xf32>
    %203 = arith.divf %201, %202 : vector<16x1xf32>
    %204 = vector.broadcast %203 : vector<16x1xf32> to vector<16x32xf32>
    %205 = arith.subf %197, %204 : vector<16x32xf32>
    %206 = arith.mulf %205, %205 : vector<16x32xf32>
    %cst_67 = arith.constant dense<0.000000e+00> : vector<16xf32>
    %207 = vector.multi_reduction <add>, %206, %cst_67 [1] : vector<16x32xf32> to vector<16xf32>
    %208 = vector.shape_cast %207 : vector<16xf32> to vector<16x1xf32>
    %cst_68 = arith.constant 3.200000e+01 : f32
    %209 = vector.broadcast %cst_68 : f32 to vector<16x1xf32>
    %210 = arith.divf %208, %209 : vector<16x1xf32>
    %211 = vector.broadcast %203 : vector<16x1xf32> to vector<16x32xf32>
    %212 = arith.subf %197, %211 : vector<16x32xf32>
    %cst_69 = arith.constant 9.99999996E-13 : f32
    %213 = vector.broadcast %cst_69 : f32 to vector<16x1xf32>
    %214 = arith.addf %210, %213 : vector<16x1xf32>
    %215 = math.rsqrt %214 : vector<16x1xf32>
    %216 = vector.broadcast %215 : vector<16x1xf32> to vector<16x32xf32>
    %217 = arith.mulf %212, %216 : vector<16x32xf32>
    %218 = vector.broadcast %198 : vector<1x32xf32> to vector<16x32xf32>
    %219 = arith.mulf %217, %218 : vector<16x32xf32>
    %220 = vector.broadcast %199 : vector<1x32xf32> to vector<16x32xf32>
    %221 = arith.addf %219, %220 : vector<16x32xf32>
    %c160_70 = arith.constant 160 : index
    %c0_71 = arith.constant 0 : index
    %222 = vector.load %arg2[%c160_70, %c0_71] : memref<384x128xbf16, #tpu.memory_space<vmem>>, vector<32x96xbf16>
    %223 = arith.truncf %221 : vector<16x32xf32> to vector<16x32xbf16>
    %cst_72 = arith.constant dense<0.000000e+00> : vector<16x96xf32>
    %224 = tpu.matmul %223, %222, %cst_72 {dimension_numbers = #tpu.dot_dimension_numbers<[1], [0], [0], [1], [0, 0, 1, 1], [], []>} : vector<16x32xbf16>, vector<32x96xbf16>, vector<16x96xf32> -> vector<16x96xf32>
    %c240 = arith.constant 240 : index
    %c0_73 = arith.constant 0 : index
    %225 = vector.load %arg3[%c240, %c0_73] : memref<320x128xf32, #tpu.memory_space<vmem>>, vector<1x96xf32>
    %226 = vector.broadcast %225 : vector<1x96xf32> to vector<16x96xf32>
    %227 = arith.addf %224, %226 : vector<16x96xf32>
    %228 = vector.extract_strided_slice %43 {offsets = [0, 0], sizes = [1, 8], strides = [1, 1]} : vector<2x8xf32> to vector<1x8xf32>
    %229 = vector.extract_strided_slice %227 {offsets = [0, 0], sizes = [8, 16], strides = [1, 1]} : vector<16x96xf32> to vector<8x16xf32>
    %230 = vector.extract_strided_slice %227 {offsets = [0, 32], sizes = [8, 16], strides = [1, 1]} : vector<16x96xf32> to vector<8x16xf32>
    %231 = vector.extract_strided_slice %227 {offsets = [0, 64], sizes = [8, 16], strides = [1, 1]} : vector<16x96xf32> to vector<8x16xf32>
    %232 = arith.truncf %229 : vector<8x16xf32> to vector<8x16xbf16>
    %233 = arith.truncf %230 : vector<8x16xf32> to vector<8x16xbf16>
    %cst_74 = arith.constant dense<0.000000e+00> : vector<8x8xf32>
    %234 = tpu.matmul %232, %233, %cst_74 {dimension_numbers = #tpu.dot_dimension_numbers<[1], [1], [0], [0], [0, 0, 1, 0], [], []>} : vector<8x16xbf16>, vector<8x16xbf16>, vector<8x8xf32> -> vector<8x8xf32>
    %235 = vector.broadcast %228 : vector<1x8xf32> to vector<8x8xf32>
    %236 = arith.addf %234, %235 : vector<8x8xf32>
    %cst_75 = arith.constant dense<0xFF800000> : vector<8xf32>
    %237 = vector.multi_reduction <maximumf>, %236, %cst_75 [1] : vector<8x8xf32> to vector<8xf32>
    %238 = vector.shape_cast %237 : vector<8xf32> to vector<8x1xf32>
    %239 = vector.broadcast %238 : vector<8x1xf32> to vector<8x8xf32>
    %240 = arith.subf %236, %239 : vector<8x8xf32>
    %241 = math.exp %240 : vector<8x8xf32>
    %cst_76 = arith.constant dense<0.000000e+00> : vector<8xf32>
    %242 = vector.multi_reduction <add>, %241, %cst_76 [1] : vector<8x8xf32> to vector<8xf32>
    %243 = vector.shape_cast %242 : vector<8xf32> to vector<8x1xf32>
    %244 = tpu.reciprocal %243 {approx = true} : vector<8x1xf32> -> vector<8x1xf32>
    %245 = vector.broadcast %244 : vector<8x1xf32> to vector<8x8xf32>
    %246 = arith.mulf %241, %245 : vector<8x8xf32>
    %247 = arith.truncf %246 : vector<8x8xf32> to vector<8x8xbf16>
    %248 = arith.truncf %231 : vector<8x16xf32> to vector<8x16xbf16>
    %cst_77 = arith.constant dense<0.000000e+00> : vector<8x16xf32>
    %249 = tpu.matmul %247, %248, %cst_77 {dimension_numbers = #tpu.dot_dimension_numbers<[1], [0], [0], [1], [0, 0, 1, 1], [], []>} : vector<8x8xbf16>, vector<8x16xbf16>, vector<8x16xf32> -> vector<8x16xf32>
    %c0_78 = arith.constant 0 : index
    %c0_79 = arith.constant 0 : index
    %250 = vector.load %arg5[%c0_78, %c0_79] : memref<16x32xf32, #tpu.memory_space<vmem>>, vector<8x16xf32>
    tpu.vector_store %arg5[%c0_78, %c0_79], %249 {strides = array<i32>} : memref<16x32xf32, #tpu.memory_space<vmem>>, vector<8x16xf32>,
    %251 = vector.extract_strided_slice %227 {offsets = [0, 16], sizes = [8, 16], strides = [1, 1]} : vector<16x96xf32> to vector<8x16xf32>
    %252 = vector.extract_strided_slice %227 {offsets = [0, 48], sizes = [8, 16], strides = [1, 1]} : vector<16x96xf32> to vector<8x16xf32>
    %253 = vector.extract_strided_slice %227 {offsets = [0, 80], sizes = [8, 16], strides = [1, 1]} : vector<16x96xf32> to vector<8x16xf32>
    %254 = arith.truncf %251 : vector<8x16xf32> to vector<8x16xbf16>
    %255 = arith.truncf %252 : vector<8x16xf32> to vector<8x16xbf16>
    %cst_80 = arith.constant dense<0.000000e+00> : vector<8x8xf32>
    %256 = tpu.matmul %254, %255, %cst_80 {dimension_numbers = #tpu.dot_dimension_numbers<[1], [1], [0], [0], [0, 0, 1, 0], [], []>} : vector<8x16xbf16>, vector<8x16xbf16>, vector<8x8xf32> -> vector<8x8xf32>
    %257 = vector.broadcast %228 : vector<1x8xf32> to vector<8x8xf32>
    %258 = arith.addf %256, %257 : vector<8x8xf32>
    %cst_81 = arith.constant dense<0xFF800000> : vector<8xf32>
    %259 = vector.multi_reduction <maximumf>, %258, %cst_81 [1] : vector<8x8xf32> to vector<8xf32>
    %260 = vector.shape_cast %259 : vector<8xf32> to vector<8x1xf32>
    %261 = vector.broadcast %260 : vector<8x1xf32> to vector<8x8xf32>
    %262 = arith.subf %258, %261 : vector<8x8xf32>
    %263 = math.exp %262 : vector<8x8xf32>
    %cst_82 = arith.constant dense<0.000000e+00> : vector<8xf32>
    %264 = vector.multi_reduction <add>, %263, %cst_82 [1] : vector<8x8xf32> to vector<8xf32>
    %265 = vector.shape_cast %264 : vector<8xf32> to vector<8x1xf32>
    %266 = tpu.reciprocal %265 {approx = true} : vector<8x1xf32> -> vector<8x1xf32>
    %267 = vector.broadcast %266 : vector<8x1xf32> to vector<8x8xf32>
    %268 = arith.mulf %263, %267 : vector<8x8xf32>
    %269 = arith.truncf %268 : vector<8x8xf32> to vector<8x8xbf16>
    %270 = arith.truncf %253 : vector<8x16xf32> to vector<8x16xbf16>
    %cst_83 = arith.constant dense<0.000000e+00> : vector<8x16xf32>
    %271 = tpu.matmul %269, %270, %cst_83 {dimension_numbers = #tpu.dot_dimension_numbers<[1], [0], [0], [1], [0, 0, 1, 1], [], []>} : vector<8x8xbf16>, vector<8x16xbf16>, vector<8x16xf32> -> vector<8x16xf32>
    %c0_84 = arith.constant 0 : index
    %c16_85 = arith.constant 16 : index
    %272 = vector.load %arg5[%c0_84, %c16_85] : memref<16x32xf32, #tpu.memory_space<vmem>>, vector<8x16xf32>
    tpu.vector_store %arg5[%c0_84, %c16_85], %271 {strides = array<i32>} : memref<16x32xf32, #tpu.memory_space<vmem>>, vector<8x16xf32>,
    %273 = vector.extract_strided_slice %43 {offsets = [1, 0], sizes = [1, 8], strides = [1, 1]} : vector<2x8xf32> to vector<1x8xf32>
    %274 = vector.extract_strided_slice %227 {offsets = [8, 0], sizes = [8, 16], strides = [1, 1]} : vector<16x96xf32> to vector<8x16xf32>
    %275 = vector.extract_strided_slice %227 {offsets = [8, 32], sizes = [8, 16], strides = [1, 1]} : vector<16x96xf32> to vector<8x16xf32>
    %276 = vector.extract_strided_slice %227 {offsets = [8, 64], sizes = [8, 16], strides = [1, 1]} : vector<16x96xf32> to vector<8x16xf32>
    %277 = arith.truncf %274 : vector<8x16xf32> to vector<8x16xbf16>
    %278 = arith.truncf %275 : vector<8x16xf32> to vector<8x16xbf16>
    %cst_86 = arith.constant dense<0.000000e+00> : vector<8x8xf32>
    %279 = tpu.matmul %277, %278, %cst_86 {dimension_numbers = #tpu.dot_dimension_numbers<[1], [1], [0], [0], [0, 0, 1, 0], [], []>} : vector<8x16xbf16>, vector<8x16xbf16>, vector<8x8xf32> -> vector<8x8xf32>
    %280 = vector.broadcast %273 : vector<1x8xf32> to vector<8x8xf32>
    %281 = arith.addf %279, %280 : vector<8x8xf32>
    %cst_87 = arith.constant dense<0xFF800000> : vector<8xf32>
    %282 = vector.multi_reduction <maximumf>, %281, %cst_87 [1] : vector<8x8xf32> to vector<8xf32>
    %283 = vector.shape_cast %282 : vector<8xf32> to vector<8x1xf32>
    %284 = vector.broadcast %283 : vector<8x1xf32> to vector<8x8xf32>
    %285 = arith.subf %281, %284 : vector<8x8xf32>
    %286 = math.exp %285 : vector<8x8xf32>
    %cst_88 = arith.constant dense<0.000000e+00> : vector<8xf32>
    %287 = vector.multi_reduction <add>, %286, %cst_88 [1] : vector<8x8xf32> to vector<8xf32>
    %288 = vector.shape_cast %287 : vector<8xf32> to vector<8x1xf32>
    %289 = tpu.reciprocal %288 {approx = true} : vector<8x1xf32> -> vector<8x1xf32>
    %290 = vector.broadcast %289 : vector<8x1xf32> to vector<8x8xf32>
    %291 = arith.mulf %286, %290 : vector<8x8xf32>
    %292 = arith.truncf %291 : vector<8x8xf32> to vector<8x8xbf16>
    %293 = arith.truncf %276 : vector<8x16xf32> to vector<8x16xbf16>
    %cst_89 = arith.constant dense<0.000000e+00> : vector<8x16xf32>
    %294 = tpu.matmul %292, %293, %cst_89 {dimension_numbers = #tpu.dot_dimension_numbers<[1], [0], [0], [1], [0, 0, 1, 1], [], []>} : vector<8x8xbf16>, vector<8x16xbf16>, vector<8x16xf32> -> vector<8x16xf32>
    %c8_90 = arith.constant 8 : index
    %c0_91 = arith.constant 0 : index
    %295 = vector.load %arg5[%c8_90, %c0_91] : memref<16x32xf32, #tpu.memory_space<vmem>>, vector<8x16xf32>
    tpu.vector_store %arg5[%c8_90, %c0_91], %294 {strides = array<i32>} : memref<16x32xf32, #tpu.memory_space<vmem>>, vector<8x16xf32>,
    %296 = vector.extract_strided_slice %227 {offsets = [8, 16], sizes = [8, 16], strides = [1, 1]} : vector<16x96xf32> to vector<8x16xf32>
    %297 = vector.extract_strided_slice %227 {offsets = [8, 48], sizes = [8, 16], strides = [1, 1]} : vector<16x96xf32> to vector<8x16xf32>
    %298 = vector.extract_strided_slice %227 {offsets = [8, 80], sizes = [8, 16], strides = [1, 1]} : vector<16x96xf32> to vector<8x16xf32>
    %299 = arith.truncf %296 : vector<8x16xf32> to vector<8x16xbf16>
    %300 = arith.truncf %297 : vector<8x16xf32> to vector<8x16xbf16>
    %cst_92 = arith.constant dense<0.000000e+00> : vector<8x8xf32>
    %301 = tpu.matmul %299, %300, %cst_92 {dimension_numbers = #tpu.dot_dimension_numbers<[1], [1], [0], [0], [0, 0, 1, 0], [], []>} : vector<8x16xbf16>, vector<8x16xbf16>, vector<8x8xf32> -> vector<8x8xf32>
    %302 = vector.broadcast %273 : vector<1x8xf32> to vector<8x8xf32>
    %303 = arith.addf %301, %302 : vector<8x8xf32>
    %cst_93 = arith.constant dense<0xFF800000> : vector<8xf32>
    %304 = vector.multi_reduction <maximumf>, %303, %cst_93 [1] : vector<8x8xf32> to vector<8xf32>
    %305 = vector.shape_cast %304 : vector<8xf32> to vector<8x1xf32>
    %306 = vector.broadcast %305 : vector<8x1xf32> to vector<8x8xf32>
    %307 = arith.subf %303, %306 : vector<8x8xf32>
    %308 = math.exp %307 : vector<8x8xf32>
    %cst_94 = arith.constant dense<0.000000e+00> : vector<8xf32>
    %309 = vector.multi_reduction <add>, %308, %cst_94 [1] : vector<8x8xf32> to vector<8xf32>
    %310 = vector.shape_cast %309 : vector<8xf32> to vector<8x1xf32>
    %311 = tpu.reciprocal %310 {approx = true} : vector<8x1xf32> -> vector<8x1xf32>
    %312 = vector.broadcast %311 : vector<8x1xf32> to vector<8x8xf32>
    %313 = arith.mulf %308, %312 : vector<8x8xf32>
    %314 = arith.truncf %313 : vector<8x8xf32> to vector<8x8xbf16>
    %315 = arith.truncf %298 : vector<8x16xf32> to vector<8x16xbf16>
    %cst_95 = arith.constant dense<0.000000e+00> : vector<8x16xf32>
    %316 = tpu.matmul %314, %315, %cst_95 {dimension_numbers = #tpu.dot_dimension_numbers<[1], [0], [0], [1], [0, 0, 1, 1], [], []>} : vector<8x8xbf16>, vector<8x16xbf16>, vector<8x16xf32> -> vector<8x16xf32>
    %c8_96 = arith.constant 8 : index
    %c16_97 = arith.constant 16 : index
    %317 = vector.load %arg5[%c8_96, %c16_97] : memref<16x32xf32, #tpu.memory_space<vmem>>, vector<8x16xf32>
    tpu.vector_store %arg5[%c8_96, %c16_97], %316 {strides = array<i32>} : memref<16x32xf32, #tpu.memory_space<vmem>>, vector<8x16xf32>,
    %c0_98 = arith.constant 0 : index
    %c0_99 = arith.constant 0 : index
    %318 = vector.load %arg5[%c0_98, %c0_99] : memref<16x32xf32, #tpu.memory_space<vmem>>, vector<16x32xf32>
    %c192_100 = arith.constant 192 : index
    %c0_101 = arith.constant 0 : index
    %319 = vector.load %arg2[%c192_100, %c0_101] : memref<384x128xbf16, #tpu.memory_space<vmem>>, vector<32x32xbf16>
    %320 = arith.truncf %318 : vector<16x32xf32> to vector<16x32xbf16>
    %cst_102 = arith.constant dense<0.000000e+00> : vector<16x32xf32>
    %321 = tpu.matmul %320, %319, %cst_102 {dimension_numbers = #tpu.dot_dimension_numbers<[1], [0], [0], [1], [0, 0, 1, 1], [], []>} : vector<16x32xbf16>, vector<32x32xbf16>, vector<16x32xf32> -> vector<16x32xf32>
    %c248 = arith.constant 248 : index
    %c0_103 = arith.constant 0 : index
    %322 = vector.load %arg3[%c248, %c0_103] : memref<320x128xf32, #tpu.memory_space<vmem>>, vector<1x32xf32>
    %323 = vector.broadcast %322 : vector<1x32xf32> to vector<16x32xf32>
    %324 = arith.addf %321, %323 : vector<16x32xf32>
    %325 = arith.addf %324, %221 : vector<16x32xf32>
    %c256 = arith.constant 256 : index
    %c0_104 = arith.constant 0 : index
    %326 = vector.load %arg3[%c256, %c0_104] : memref<320x128xf32, #tpu.memory_space<vmem>>, vector<1x32xf32>
    %c264 = arith.constant 264 : index
    %c0_105 = arith.constant 0 : index
    %327 = vector.load %arg3[%c264, %c0_105] : memref<320x128xf32, #tpu.memory_space<vmem>>, vector<1x32xf32>
    %cst_106 = arith.constant dense<0.000000e+00> : vector<16xf32>
    %328 = vector.multi_reduction <add>, %325, %cst_106 [1] : vector<16x32xf32> to vector<16xf32>
    %329 = vector.shape_cast %328 : vector<16xf32> to vector<16x1xf32>
    %cst_107 = arith.constant 3.200000e+01 : f32
    %330 = vector.broadcast %cst_107 : f32 to vector<16x1xf32>
    %331 = arith.divf %329, %330 : vector<16x1xf32>
    %332 = vector.broadcast %331 : vector<16x1xf32> to vector<16x32xf32>
    %333 = arith.subf %325, %332 : vector<16x32xf32>
    %334 = arith.mulf %333, %333 : vector<16x32xf32>
    %cst_108 = arith.constant dense<0.000000e+00> : vector<16xf32>
    %335 = vector.multi_reduction <add>, %334, %cst_108 [1] : vector<16x32xf32> to vector<16xf32>
    %336 = vector.shape_cast %335 : vector<16xf32> to vector<16x1xf32>
    %cst_109 = arith.constant 3.200000e+01 : f32
    %337 = vector.broadcast %cst_109 : f32 to vector<16x1xf32>
    %338 = arith.divf %336, %337 : vector<16x1xf32>
    %339 = vector.broadcast %331 : vector<16x1xf32> to vector<16x32xf32>
    %340 = arith.subf %325, %339 : vector<16x32xf32>
    %cst_110 = arith.constant 9.99999996E-13 : f32
    %341 = vector.broadcast %cst_110 : f32 to vector<16x1xf32>
    %342 = arith.addf %338, %341 : vector<16x1xf32>
    %343 = math.rsqrt %342 : vector<16x1xf32>
    %344 = vector.broadcast %343 : vector<16x1xf32> to vector<16x32xf32>
    %345 = arith.mulf %340, %344 : vector<16x32xf32>
    %346 = vector.broadcast %326 : vector<1x32xf32> to vector<16x32xf32>
    %347 = arith.mulf %345, %346 : vector<16x32xf32>
    %348 = vector.broadcast %327 : vector<1x32xf32> to vector<16x32xf32>
    %349 = arith.addf %347, %348 : vector<16x32xf32>
    %c224_111 = arith.constant 224 : index
    %c0_112 = arith.constant 0 : index
    %350 = vector.load %arg2[%c224_111, %c0_112] : memref<384x128xbf16, #tpu.memory_space<vmem>>, vector<32x64xbf16>
    %351 = arith.truncf %349 : vector<16x32xf32> to vector<16x32xbf16>
    %cst_113 = arith.constant dense<0.000000e+00> : vector<16x64xf32>
    %352 = tpu.matmul %351, %350, %cst_113 {dimension_numbers = #tpu.dot_dimension_numbers<[1], [0], [0], [1], [0, 0, 1, 1], [], []>} : vector<16x32xbf16>, vector<32x64xbf16>, vector<16x64xf32> -> vector<16x64xf32>
    %c272 = arith.constant 272 : index
    %c0_114 = arith.constant 0 : index
    %353 = vector.load %arg3[%c272, %c0_114] : memref<320x128xf32, #tpu.memory_space<vmem>>, vector<1x64xf32>
    %354 = vector.broadcast %353 : vector<1x64xf32> to vector<16x64xf32>
    %355 = arith.addf %352, %354 : vector<16x64xf32>
    %cst_115 = arith.constant 5.000000e-01 : f32
    %356 = vector.broadcast %cst_115 : f32 to vector<16x64xf32>
    %357 = arith.mulf %356, %355 : vector<16x64xf32>
    %cst_116 = arith.constant 4.471500e-02 : f32
    %358 = vector.broadcast %cst_116 : f32 to vector<16x64xf32>
    %359 = arith.mulf %358, %355 : vector<16x64xf32>
    %360 = arith.mulf %359, %355 : vector<16x64xf32>
    %361 = arith.mulf %360, %355 : vector<16x64xf32>
    %362 = arith.addf %355, %361 : vector<16x64xf32>
    %cst_117 = arith.constant 0.797884583 : f32
    %363 = vector.broadcast %cst_117 : f32 to vector<16x64xf32>
    %364 = arith.mulf %363, %362 : vector<16x64xf32>
    %365 = math.tanh %364 : vector<16x64xf32>
    %cst_118 = arith.constant 1.000000e+00 : f32
    %366 = vector.broadcast %cst_118 : f32 to vector<16x64xf32>
    %367 = arith.addf %366, %365 : vector<16x64xf32>
    %368 = arith.mulf %357, %367 : vector<16x64xf32>
    %c256_119 = arith.constant 256 : index
    %c0_120 = arith.constant 0 : index
    %369 = vector.load %arg2[%c256_119, %c0_120] : memref<384x128xbf16, #tpu.memory_space<vmem>>, vector<64x32xbf16>
    %370 = arith.truncf %368 : vector<16x64xf32> to vector<16x64xbf16>
    %cst_121 = arith.constant dense<0.000000e+00> : vector<16x32xf32>
    %371 = tpu.matmul %370, %369, %cst_121 {dimension_numbers = #tpu.dot_dimension_numbers<[1], [0], [0], [1], [0, 0, 1, 1], [], []>} : vector<16x64xbf16>, vector<64x32xbf16>, vector<16x32xf32> -> vector<16x32xf32>
    %c280 = arith.constant 280 : index
    %c0_122 = arith.constant 0 : index
    %372 = vector.load %arg3[%c280, %c0_122] : memref<320x128xf32, #tpu.memory_space<vmem>>, vector<1x32xf32>
    %373 = vector.broadcast %372 : vector<1x32xf32> to vector<16x32xf32>
    %374 = arith.addf %371, %373 : vector<16x32xf32>
    %375 = arith.addf %374, %349 : vector<16x32xf32>
    %c288 = arith.constant 288 : index
    %c0_123 = arith.constant 0 : index
    %376 = vector.load %arg3[%c288, %c0_123] : memref<320x128xf32, #tpu.memory_space<vmem>>, vector<1x32xf32>
    %c296 = arith.constant 296 : index
    %c0_124 = arith.constant 0 : index
    %377 = vector.load %arg3[%c296, %c0_124] : memref<320x128xf32, #tpu.memory_space<vmem>>, vector<1x32xf32>
    %cst_125 = arith.constant dense<0.000000e+00> : vector<16xf32>
    %378 = vector.multi_reduction <add>, %375, %cst_125 [1] : vector<16x32xf32> to vector<16xf32>
    %379 = vector.shape_cast %378 : vector<16xf32> to vector<16x1xf32>
    %cst_126 = arith.constant 3.200000e+01 : f32
    %380 = vector.broadcast %cst_126 : f32 to vector<16x1xf32>
    %381 = arith.divf %379, %380 : vector<16x1xf32>
    %382 = vector.broadcast %381 : vector<16x1xf32> to vector<16x32xf32>
    %383 = arith.subf %375, %382 : vector<16x32xf32>
    %384 = arith.mulf %383, %383 : vector<16x32xf32>
    %cst_127 = arith.constant dense<0.000000e+00> : vector<16xf32>
    %385 = vector.multi_reduction <add>, %384, %cst_127 [1] : vector<16x32xf32> to vector<16xf32>
    %386 = vector.shape_cast %385 : vector<16xf32> to vector<16x1xf32>
    %cst_128 = arith.constant 3.200000e+01 : f32
    %387 = vector.broadcast %cst_128 : f32 to vector<16x1xf32>
    %388 = arith.divf %386, %387 : vector<16x1xf32>
    %389 = vector.broadcast %381 : vector<16x1xf32> to vector<16x32xf32>
    %390 = arith.subf %375, %389 : vector<16x32xf32>
    %cst_129 = arith.constant 9.99999996E-13 : f32
    %391 = vector.broadcast %cst_129 : f32 to vector<16x1xf32>
    %392 = arith.addf %388, %391 : vector<16x1xf32>
    %393 = math.rsqrt %392 : vector<16x1xf32>
    %394 = vector.broadcast %393 : vector<16x1xf32> to vector<16x32xf32>
    %395 = arith.mulf %390, %394 : vector<16x32xf32>
    %396 = vector.broadcast %376 : vector<1x32xf32> to vector<16x32xf32>
    %397 = arith.mulf %395, %396 : vector<16x32xf32>
    %398 = vector.broadcast %377 : vector<1x32xf32> to vector<16x32xf32>
    %399 = arith.addf %397, %398 : vector<16x32xf32>
    %400 = vector.shape_cast %399 : vector<16x32xf32> to vector<2x8x32xf32>
    %401 = vector.extract_strided_slice %400 {offsets = [0, 0, 0], sizes = [2, 1, 32], strides = [1, 1, 1]} : vector<2x8x32xf32> to vector<2x1x32xf32>
    %402 = vector.shape_cast %401 : vector<2x1x32xf32> to vector<2x32xf32>
    %c320 = arith.constant 320 : index
    %c0_130 = arith.constant 0 : index
    %403 = vector.load %arg2[%c320, %c0_130] : memref<384x128xbf16, #tpu.memory_space<vmem>>, vector<32x32xbf16>
    %404 = arith.truncf %402 : vector<2x32xf32> to vector<2x32xbf16>
    %cst_131 = arith.constant dense<0.000000e+00> : vector<2x32xf32>
    %405 = tpu.matmul %404, %403, %cst_131 {dimension_numbers = #tpu.dot_dimension_numbers<[1], [0], [0], [1], [0, 0, 1, 1], [], []>} : vector<2x32xbf16>, vector<32x32xbf16>, vector<2x32xf32> -> vector<2x32xf32>
    %c304 = arith.constant 304 : index
    %c0_132 = arith.constant 0 : index
    %406 = vector.load %arg3[%c304, %c0_132] : memref<320x128xf32, #tpu.memory_space<vmem>>, vector<1x32xf32>
    %407 = vector.broadcast %406 : vector<1x32xf32> to vector<2x32xf32>
    %408 = arith.addf %405, %407 : vector<2x32xf32>
    %409 = math.tanh %408 : vector<2x32xf32>
    %c352 = arith.constant 352 : index
    %c0_133 = arith.constant 0 : index
    %410 = vector.load %arg2[%c352, %c0_133] : memref<384x128xbf16, #tpu.memory_space<vmem>>, vector<32x128xbf16>
    %411 = arith.truncf %409 : vector<2x32xf32> to vector<2x32xbf16>
    %cst_134 = arith.constant dense<0.000000e+00> : vector<2x128xf32>
    %412 = tpu.matmul %411, %410, %cst_134 {dimension_numbers = #tpu.dot_dimension_numbers<[1], [0], [0], [1], [0, 0, 1, 1], [], []>} : vector<2x32xbf16>, vector<32x128xbf16>, vector<2x128xf32> -> vector<2x128xf32>
    %c312 = arith.constant 312 : index
    %c0_135 = arith.constant 0 : index
    %413 = vector.load %arg3[%c312, %c0_135] : memref<320x128xf32, #tpu.memory_space<vmem>>, vector<1x128xf32>
    %414 = vector.broadcast %413 : vector<1x128xf32> to vector<2x128xf32>
    %415 = arith.addf %412, %414 : vector<2x128xf32>
    %c0_136 = arith.constant 0 : index
    %c0_137 = arith.constant 0 : index
    %416 = vector.load %arg4[%c0_136, %c0_137] : memref<2x128xf32, #tpu.memory_space<vmem>>, vector<2x128xf32>
    tpu.vector_store %arg4[%c0_136, %c0_137], %415 {strides = array<i32>} : memref<2x128xf32, #tpu.memory_space<vmem>>, vector<2x128xf32>,
    return
  }
}

</mosaic_0001>

<bundles_post_ra>
// kernel: bert_classifier_forward.1
= control target key start
LH: loop header
LB: loop body
LE: loop exit
PB: predicated region body
PF: predicated region fallthrough
CT: control target
= control target key end

     0   :  { %9 = vsyncpa [#allocation4], 0  ;;  %s2989_s0 = inlined_call_operand.vmem [shape: s32[16,1], index: 0, kind: input, shape index: {}]   ;;  %s2990_s1 = inlined_call_operand.vmem [shape: s32[2,8], index: 1, kind: input, shape index: {}]   ;;  %s2991_s2 = inlined_call_operand.hbm [shape: bf16[384,128], index: 2, kind: input, shape index: {}]   ;;  %s2992_s3 = inlined_call_operand.hbm [shape: f32[320,128], index: 3, kind: input, shape index: {}]   ;;  %s2993_s4 = inlined_call_operand.hbm [shape: f32[2,128], index: 4, kind: output, shape index: {}]  }
   0x1   :  { %10 = vsyncpa [#allocation7], 0 }
   0x2   :  { %11 = vsyncpa [#allocation5], 0  ;;  %s2629_s15 = smov [#allocation3]   ;;  %s2557_s19 = scalar_lea.hbm %s2991_s2, 3072 }
   0x3   :  { %s21_s16 = sshll.u32 %s2629_s15, 4  ;;  %p2558_p0 = scmp.ne.s32.totalorder %s2991_s2, %s2557_s19  ;;  %s22_s16 = int_to_ptr.vmem [resolvable:$true] %s21_s16 }
   0x4   :  { %p2561_p1 = scmp.lt.u32.totalorder %s2557_s19, %s2991_s2 }
   0x6   :  { %p2563_p2 = pnand %p2561_p1, %p2558_p0 }
   0x8   :  { %2566 = shalt.err (!%p2563_p2)
}
   0x9   :  { %s2567_s24 = scalar_lea.vmem %s22_s16, 3072  ;;  %p2572_p4 = scmp.lt.s32.totalorder %s22_s16, %s22_s16 }
   0xa   :  { %p2568_p3 = scmp.ne.s32.totalorder %s22_s16, %s2567_s24  ;;  %p2573_p5 = scmp.lt.s32.totalorder %s2567_s24, %s2567_s24 }
   0xc   :  { %p2574_p6 = por %p2573_p5, %p2572_p4 }
   0xe   :  { %p2575_p7 = pnand %p2574_p6, %p2568_p3 }
  0x10   :  { %2578 = shalt.err (!%p2575_p7)
}
  0x11   :  { %s2630_s25 = smov 64   ;;  %s2631_s26 = smov 4  }
  0x12   :  { %27 = dma.hbm_to_vmem [thread:$0]  %s2991_s2, 3072, %s22_s16, [#allocation4], %s2630_s25, %s2630_s25, %s2631_s26  }
  0x13   :  { %s2632_s29 = smov [#allocation6]   ;;  %s2579_s7 = scalar_lea.hbm %s2992_s3, 5120 }
  0x14   :  { %s33_s30 = sshll.u32 %s2632_s29, 4  ;;  %p2580_p8 = scmp.ne.s32.totalorder %s2992_s3, %s2579_s7  ;;  %s34_s30 = int_to_ptr.vmem [resolvable:$true] %s33_s30 }
  0x15   :  { %p2583_p9 = scmp.lt.u32.totalorder %s2579_s7, %s2992_s3 }
  0x17   :  { %p2585_p10 = pnand %p2583_p9, %p2580_p8 }
  0x19   :  { %2588 = shalt.err (!%p2585_p10)
}
  0x1a   :  { %s2589_s12 = scalar_lea.vmem %s34_s30, 5120  ;;  %p2594_p12 = scmp.lt.s32.totalorder %s34_s30, %s34_s30 }
  0x1b   :  { %p2590_p11 = scmp.ne.s32.totalorder %s34_s30, %s2589_s12  ;;  %p2595_p13 = scmp.lt.s32.totalorder %s2589_s12, %s2589_s12 }
  0x1d   :  { %p2596_p0 = por %p2595_p13, %p2594_p12 }
  0x1f   :  { %p2597_p1 = pnand %p2596_p0, %p2590_p11 }
  0x21   :  { %2600 = shalt.err (!%p2597_p1)
}
  0x22   :  { %s2633_s2 = smov 128   ;;  %s2634_s13 = smov 8  }
  0x23   :  { %39 = dma.hbm_to_vmem [thread:$0]  %s2992_s3, 5120, %s34_s30, [#allocation7], %s2633_s2, %s2633_s2, %s2634_s13  }
  0x24   :  { %2623 = dma.done.wait [#allocation4], 3072  }
  0x25   :  { %2624 = vsyncadd [#allocation4], 4294964224 }
  0x26   :  { %2625 = dma.done.wait [#allocation7], 5120  }
  0x27   :  { %2626 = vsyncadd [#allocation7], 4294962176  ;;  %v2635_v0 = vmov 0   ;;  %v47_v1 = vld [vmem:[%s2989_s0] sm:$0xff]  ;;  %v63_v2 = vld [vmem:[#allocation6] sm:$0xff]  ;;  %v49_v27 = vlaneseq  ;;  %v2636_v30 = vmov 1.0  }
  0x28   :  { %2470 = vset.pattern.permute.xlu0 %v2635_v0  ;;  %v64_v3 = vld [vmem:[#allocation6 + $0x8] sm:$0xff]  ;;  %v65_v4 = vld [vmem:[#allocation6 + $0x10] sm:$0xff]  ;;  %v66_v5 = vld [vmem:[#allocation6 + $0x18] sm:$0xff]  ;;  %vm159_vm2 = vcmask 261120   ;;  %v2637_v50 = vmov 0.0   ;;  %vm2638_vm3 = vmmov 0  }
  0x29   :  { %52 = vperm.xlu0 %2470, %v47_v1   ;;  %v48_v6 = vld [vmem:[%s2989_s0 + $0x8] sm:$0xff]  ;;  %v2422_v7 = vpack.c.bf16 %v64_v3, %v63_v2  ;;  %v2426_v8 = vpack.c.bf16 %v66_v5, %v65_v4  ;;  %v67_v9 = vld [vmem:[#allocation6 + $0x20] sm:$0xff]  ;;  %v68_v10 = vld [vmem:[#allocation6 + $0x28] sm:$0xff]  ;;  %v50_v28 = vand.u32 127, %v49_v27  ;;  %2238 = vmatprep.subr.bf16.mxu1 %v2637_v50  ;;  %s2639_s0 = smov 96   ;;  %vm277_vm4 = vcmask 130048  }
  0x2a   :  { %v69_v11 = vld [vmem:[#allocation6 + $0x30] sm:$0xff]  ;;  %v70_v12 = vld [vmem:[#allocation6 + $0x38] sm:$0xff]  ;;  %v2430_v13 = vpack.c.bf16 %v68_v10, %v67_v9  ;;  %v71_v14 = vld [vmem:[#allocation6 + $0x40] sm:$0xff]  ;;  %2242 = vmatprep.mubr.msk.bf16.mxu1 %vm2638_vm3, %v2637_v50  ;;  %vm342_vm5 = vcmask 1043456   ;;  %vm324_vm6 = vcmask 64512   ;;  %s2641_s21 = smov 80  }
  0x2b   :  { %2423 = vmatprep.subr.bf16.mxu0 %v2422_v7  ;;  %v72_v15 = vld [vmem:[#allocation6 + $0x48] sm:$0xff]  ;;  %v2434_v16 = vpack.c.bf16 %v70_v12, %v69_v11  ;;  %v73_v17 = vld [vmem:[#allocation6 + $0x50] sm:$0xff]  ;;  %v74_v18 = vld [vmem:[#allocation6 + $0x58] sm:$0xff]  ;;  %s2642_s22 = smov 48   ;;  %s2643_s23 = smov 16   ;;  %vm501_vm7 = vcmask 261248  }
  0x2c   :  { %2425 = vmatpush3.bf16.msra.mxu0 %v2422_v7  ;;  %v2438_v19 = vpack.c.bf16 %v72_v15, %v71_v14  ;;  %v75_v20 = vld [vmem:[#allocation6 + $0x60] sm:$0xff]  ;;  %v76_v21 = vld [vmem:[#allocation6 + $0x68] sm:$0xff]  ;;  %v2442_v22 = vpack.c.bf16 %v74_v18, %v73_v17  ;;  %v77_v24 = vld [vmem:[#allocation6 + $0x70] sm:$0xff]  ;;  %vm965_vm8 = vcmask 523264   ;;  %vm1904_vm9 = vcmask 1041409   ;;  %s2644_s24 = smov [#allocation8]  }
  0x2d   :  { %55 = vperm.xlu0 %2470, %v48_v6   ;;  %2427 = vmatprep.subr.bf16.mxu0 %v2426_v8  ;;  %v2446_v23 = vpack.c.bf16 %v76_v21, %v75_v20  ;;  %v78_v25 = vld [vmem:[#allocation6 + $0x78] sm:$0xff]  ;;  %v154_v32 = vld [vmem:[#allocation6 + $0x80] sm:$0xff]  ;;  %v2472_v51 = vld [vmem:[#allocation3 + $0x8] sm:$0xff]  }
  0x2e   :  { %v2450_v26 = vpack.c.bf16 %v78_v25, %v77_v24  ;;  %v2471_v49 = vld [vmem:[#allocation3] sm:$0xff]   ;;  %v2050_v0 = vld [vmem:[#allocation6 + $0xa8] ss:$0 sm:$0xff]  ;;  %v2051_v5 = vld [vmem:[#allocation6 + $0xb0] ss:$0 sm:$0xff] }
  0x2f   :  { %2239 = vmatpush3.bf16.msra.mxu1 %v2471_v49  ;;  %v2049_v60 = vld [vmem:[#allocation6 + $0xa0] ss:$0 sm:$0xff]  ;;  %v199_v17 = vld [vmem:[%s2990_s1] sm:$0x3]  ;;  %s2640_s1 = smov 112  }
  0x30   :  { %2429 = vmatpush3.bf16.msra.mxu0 %v2426_v8  ;;  %2240 = vmatprep.subr.bf16.mxu1 %v2637_v50  ;;  %v200_v18 = vcvt.s32.f32 %v199_v17 }
  0x31   :  { %2431 = vmatprep.subr.bf16.mxu0 %v2430_v13 }
  0x32   :  { %v201_v20 = vsub.f32 1.0, %v200_v18 }
  0x33   :  { %2241 = vmatpush3.bf16.msra.mxu1 %v2472_v51 }
  0x34   :  { %2433 = vmatpush3.bf16.msra.mxu0 %v2430_v13  ;;  %2246 = vmatprep.subr.bf16.mxu1 %v2637_v50 }
  0x35   :  { %2435 = vmatprep.subr.bf16.mxu0 %v2434_v16 }
  0x38   :  { %2437 = vmatpush3.bf16.msra.mxu0 %v2434_v16 }
  0x39   :  { %2439 = vmatprep.subr.bf16.mxu0 %v2438_v19 }
  0x3c   :  { %2441 = vmatpush3.bf16.msra.mxu0 %v2438_v19  ;;  %v2742_v19 = vshrl.u32 %v49_v27, 7 }
  0x3d   :  { %2443 = vmatprep.subr.bf16.mxu0 %v2442_v22 }
  0x3e   :  { %v272_v21 = vsub.s32 0, %v2742_v19 }
  0x40   :  { %2445 = vmatpush3.bf16.msra.mxu0 %v2442_v22  ;;  %v2745_v22 = vmul.f32 -10000.0, %v201_v20 }
  0x41   :  { %2447 = vmatprep.subr.bf16.mxu0 %v2446_v23 }
  0x44   :  { %2449 = vmatpush3.bf16.msra.mxu0 %v2446_v23  ;;  %v2748_v23 = vrot.slane %v2745_v22, %v272_v21 }
  0x45   :  { %2451 = vmatprep.subr.bf16.mxu0 %v2450_v26 }
  0x48   :  { %2453 = vmatpush3.bf16.msra.mxu0 %v2450_v26 }
  0x49   :  { %2264 = vmatprep.subr.bf16.mxu0 %v2637_v50 }
  0xa8   :  { %v53_v29 = vpop.permute.xlu0 %52 }
  0xa9   :  { %vm57_vm0 = vcmp.eq.s32.totalorder %v50_v28, %v53_v29 }
  0xaa   :  { %2235 = vmatprep.mubr.msk.f32.mxu0 %vm57_vm0, %v2636_v30 }
  0xac   :  { %v56_v31 = vpop.permute.xlu0 %55 }
  0xad   :  { %vm58_vm1 = vcmp.eq.s32.totalorder %v50_v28, %v56_v31 }
  0xae   :  { %2236 = vmatmul.mubr.msk.f32.vlgmr.msra.gmra.mrb[0].mxu0 %vm58_vm1, %v2636_v30 }
  0xaf   :  { %2266 = vmatprep.mubr.msk.bf16.mxu0 %vm2638_vm3, %v2637_v50 }
 0x181   :  { %v2237_v33 = vpop.f32.mrb[0].mxu0 }
 0x182   :  { %v145_v34 = vpop.f32.mrb[1].mxu0  ;;  %v156_v36 = vadd.f32 %v2237_v33, %v154_v32 }
 0x183   :  { %v155_v35 = vadd.f32 %v154_v32, %v145_v34 }
 0x184   :  { %v163_v38 = vsel %vm159_vm2, %v156_v36, 0.0 }
 0x185   :  { %v160_v37 = vsel %vm159_vm2, %v155_v35, 0.0 }
 0x186   :  { %161 = vadd.xlane.f32.xlu1 %v160_v37 }
 0x18a   :  { %164 = vadd.xlane.f32.xlu1 %v163_v38 }
 0x213   :  { %v162_v39 = vpop.xlane.xlu1 %161 }
 0x214   :  { %v167_v40 = vmul.f32 0.03125, %v162_v39 }
 0x216   :  { %v169_v41 = vsub.f32 %v155_v35, %v167_v40 }
 0x217   :  { %v165_v42 = vpop.xlane.xlu1 %164 }
 0x218   :  { %v168_v43 = vmul.f32 0.03125, %v165_v42  ;;  %v171_v44 = vmul.f32 %v169_v41, %v169_v41 }
 0x21a   :  { %v170_v45 = vsub.f32 %v156_v36, %v168_v43  ;;  %v173_v46 = vsel %vm159_vm2, %v171_v44, 0.0 }
 0x21b   :  { %174 = vadd.xlane.f32.xlu0 %v173_v46 }
 0x21c   :  { %v172_v47 = vmul.f32 %v170_v45, %v170_v45 }
 0x21e   :  { %v176_v48 = vsel %vm159_vm2, %v172_v47, 0.0 }
 0x21f   :  { %177 = vadd.xlane.f32.xlu1 %v176_v48 }
 0x2a8   :  { %v175_v52 = vpop.xlane.xlu0 %174 }
 0x2a9   :  { %v179_v53 = vmul.f32 0.03125, %v175_v52 }
 0x2ab   :  { %v181_v54 = vadd.f32 1e-12, %v179_v53 }
 0x2ac   :  { %v178_v55 = vpop.xlane.xlu1 %177 }
 0x2ad   :  { %2495 = vrsqrt.f32 %v181_v54  ;;  %v180_v56 = vmul.f32 0.03125, %v178_v55  ;;  %v506_v54 = vsub.s32 1, %v2742_v19 }
 0x2af   :  { %v182_v57 = vadd.f32 1e-12, %v180_v56 }
 0x2b1   :  { %2497 = vrsqrt.f32 %v182_v57 }
 0x2b7   :  { %v2496_v58 = vpop.eup %2495 }
 0x2b8   :  { %v185_v59 = vmul.f32 %v2496_v58, %v169_v41 }
 0x2ba   :  { %v191_v63 = vmul.f32 %v2049_v60, %v185_v59 }
 0x2bb   :  { %v2498_v61 = vpop.eup %2497 }
 0x2bc   :  { %v186_v62 = vmul.f32 %v2498_v61, %v170_v45  ;;  %v2715_v2 = vadd.f32 %v2050_v0, %v191_v63 }
 0x2be   :  { %v192_v1 = vmul.f32 %v2049_v60, %v186_v62  ;;  %v2789_v60 = vrot.slane %v2745_v22, %v506_v54 }
 0x2c0   :  { %v2717_v3 = vadd.f32 %v2050_v0, %v192_v1 }
 0x2c2   :  { %v207_v4 = vpack.c.bf16 %v2717_v3, %v2715_v2 }
 0x2c4   :  { %2243 = vmatmul.mubr.msk.bf16.vlgmr.msra.gmra.mrb[0].mxu1 %vm159_vm2, %v207_v4 }
 0x2c5   :  { %2248 = vmatprep.mubr.msk.bf16.mxu1 %vm2638_vm3, %v2637_v50 }
 0x397   :  { %v262_v6 = vpop.f32.mrb[0].mxu1 }
 0x398   :  { %v263_v7 = vadd.f32 %v2051_v5, %v262_v6  ;;  %v2244_v8 = vpop.f32.mrb[1].mxu1 }
 0x399   :  { %v265_v9 = vpop.f32.mrb[2].mxu1 }
 0x39a   :  { %v2724_v10 = vpack.c.bf16 %v263_v7, %v263_v7  ;;  %v266_v11 = vadd.f32 %v2051_v5, %v265_v9  ;;  %v2245_v12 = vpop.f32.mrb[3].mxu1 }
 0x39c   :  { %337 = vrot.lane.b32.xlu0 %v2724_v10, %s2630_s25  ;;  %275 = vrot.lane.b32.xlu1 %v2724_v10, %s2639_s0  ;;  %v2757_v35 = vpack.c.bf16 %v266_v11, %v266_v11 }
 0x40e   :  { %v276_v13 = vpop.permute.xlu1 %275  ;;  %v338_v15 = vpop.permute.xlu0 %337 }
 0x40f   :  { %v282_v14 = vsel %vm277_vm4, %v276_v13, 0  ;;  %v344_v16 = vsel %vm342_vm5, %v338_v15, 0 }
 0x410   :  { %2247 = vmatpush3.bf16.xpose.msra.mxu1 %v282_v14 }
 0x411   :  { %2252 = vmatprep.subr.bf16.mxu1 %v2637_v50 }
 0x417   :  { %2249 = vmatmul.mubr.msk.bf16.vlgmr.msra.gmra.mrb[4].mxu1 %vm277_vm4, %v2724_v10 }
 0x418   :  { %2253 = vmatpush3.bf16.msra.mxu1 %v344_v16  ;;  %2254 = vmatprep.mubr.msk.bf16.mxu1 %vm2638_vm3, %v2637_v50 }
 0x419   :  { %2258 = vmatprep.subr.bf16.mxu1 %v2637_v50 }
 0x4ea   :  { %v318_v24 = vpop.f32.mrb[4].mxu1 }
 0x4eb   :  { %v319_v25 = vadd.f32 %v318_v24, %v2748_v23  ;;  %v2250_v26 = vpop.f32.mrb[5].mxu1 }
 0x4ec   :  { %v321_v28 = vpop.f32.mrb[6].mxu1 }
 0x4ed   :  { %v2251_v29 = vpop.f32.mrb[7].mxu1  ;;  %v325_v30 = vsel %vm324_vm6, %v319_v25, -inf }
 0x4ee   :  { %326 = vmax.xlane.f32.xlu1 %v325_v30 }
 0x4ff   :  { %387 = vrot.lane.b32.xlu1 %v2724_v10, %s2640_s1 }
 0x57b   :  { %v327_v27 = vpop.xlane.xlu1 %326 }
 0x57c   :  { %v328_v31 = vsub.f32 %v319_v25, %v327_v27 }
 0x57e   :  { %v329_v32 = vmul.f32 1.442695, %v328_v31 }
 0x57f   :  { %v388_v43 = vpop.permute.xlu1 %387 }
 0x580   :  { %2499 = vpow2.f32 %v329_v32 }
 0x58a   :  { %v2500_v33 = vpop.eup %2499 }
 0x58b   :  { %v331_v34 = vsel %vm324_vm6, %v2500_v33, 0.0 }
 0x58c   :  { %332 = vadd.xlane.f32.xlu0 %v331_v34 }
 0x5a2   :  { %389 = vrot.lane.b32.xlu0 %v2724_v10, %s2641_s21 }
 0x5a6   :  { %509 = vrot.lane.b32.xlu0 %v2757_v35, %s2639_s0 }
 0x5aa   :  { %620 = vrot.lane.b32.xlu0 %v2757_v35, %s2641_s21 }
 0x5ae   :  { %618 = vrot.lane.b32.xlu0 %v2757_v35, %s2640_s1 }
 0x619   :  { %v333_v36 = vpop.xlane.xlu0 %332 }
 0x61a   :  { %2501 = vrcp.f32 %v333_v36 }
 0x61d   :  { %v390_v39 = vpop.permute.xlu0 %389 }
 0x61e   :  { %v395_v41 = vsel %vm277_vm4, %v390_v39, 0 }
 0x621   :  { %v510_v42 = vpop.permute.xlu0 %509 }
 0x622   :  { %v515_v44 = vsel %vm277_vm4, %v510_v42, 0 }
 0x624   :  { %v2502_v37 = vpop.eup %2501 }
 0x625   :  { %v335_v38 = vmul.f32 %v2502_v37, %v2500_v33  ;;  %v621_v45 = vpop.permute.xlu0 %620 }
 0x626   :  { %v626_v46 = vsel %vm277_vm4, %v621_v45, 0 }
 0x627   :  { %v336_v40 = vpack.c.bf16 %v335_v38, %v335_v38 }
 0x629   :  { %2255 = vmatmul.mubr.msk.bf16.vlgmr.msra.gmra.mrb[8].mxu1 %vm324_vm6, %v336_v40  ;;  %v619_v47 = vpop.permute.xlu0 %618 }
 0x62a   :  { %2259 = vmatpush3.bf16.xpose.msra.mxu1 %v395_v41  ;;  %2260 = vmatprep.mubr.msk.bf16.mxu1 %vm2638_vm3, %v2637_v50 }
 0x62b   :  { %2270 = vmatprep.subr.bf16.mxu1 %v2637_v50 }
 0x631   :  { %2261 = vmatmul.mubr.msk.bf16.vlgmr.msra.gmra.mrb[12].mxu1 %vm277_vm4, %v388_v43 }
 0x632   :  { %2271 = vmatpush3.bf16.xpose.msra.mxu1 %v515_v44  ;;  %2272 = vmatprep.mubr.msk.bf16.mxu1 %vm2638_vm3, %v2637_v50 }
 0x633   :  { %2282 = vmatprep.subr.bf16.mxu1 %v2637_v50 }
 0x639   :  { %2273 = vmatmul.mubr.msk.bf16.vlgmr.msra.gmra.mrb[16].mxu1 %vm277_vm4, %v2757_v35 }
 0x63a   :  { %2283 = vmatpush3.bf16.xpose.msra.mxu1 %v626_v46  ;;  %2284 = vmatprep.mubr.msk.bf16.mxu1 %vm2638_vm3, %v2637_v50 }
 0x63b   :  { %2294 = vmatprep.subr.bf16.mxu1 %v2637_v50 }
 0x641   :  { %2285 = vmatmul.mubr.msk.bf16.vlgmr.msra.gmra.mrb[20].mxu1 %vm277_vm4, %v619_v47 }
 0x642   :  { %2298 = vmatprep.mubr.msk.bf16.mxu1 %vm2638_vm3, %v2637_v50 }
 0x6fc   :  { %v380_v48 = vpop.f32.mrb[8].mxu1 }
 0x6fd   :  { %386 = vst.msk [vmem:[#allocation2] sm:$0xff] %vm277_vm4, %v380_v48  ;;  %v2256_v49 = vpop.f32.mrb[9].mxu1 }
 0x6fe   :  { %v383_v51 = vpop.f32.mrb[10].mxu1  ;;  %v2473_v49 = vld [vmem:[#allocation3 + $0x10] sm:$0xff]  }
 0x6ff   :  { %v2257_v52 = vpop.f32.mrb[11].mxu1  ;;  %2295 = vmatpush3.bf16.msra.mxu1 %v2473_v49  ;;  %v2474_v51 = vld [vmem:[#allocation3 + $0x18] sm:$0xff]  }
 0x700   :  { %2296 = vmatprep.subr.bf16.mxu1 %v2637_v50 }
 0x703   :  { %2297 = vmatpush3.bf16.msra.mxu1 %v2474_v51 }
 0x704   :  { %v431_v53 = vpop.f32.mrb[12].mxu1  ;;  %2310 = vmatprep.subr.bf16.mxu1 %v2637_v50 }
 0x705   :  { %v432_v55 = vadd.f32 %v431_v53, %v2748_v23  ;;  %v2262_v56 = vpop.f32.mrb[13].mxu1 }
 0x706   :  { %v434_v57 = vpop.f32.mrb[14].mxu1 }
 0x707   :  { %v2263_v58 = vpop.f32.mrb[15].mxu1  ;;  %v437_v59 = vsel %vm324_vm6, %v432_v55, -inf }
 0x708   :  { %438 = vmax.xlane.f32.xlu0 %v437_v59 }
 0x70c   :  { %v551_v61 = vpop.f32.mrb[16].mxu1 }
 0x70d   :  { %v552_v62 = vadd.f32 %v551_v61, %v2789_v60  ;;  %v2274_v63 = vpop.f32.mrb[17].mxu1 }
 0x70e   :  { %v554_v0 = vpop.f32.mrb[18].mxu1 }
 0x70f   :  { %v2275_v1 = vpop.f32.mrb[19].mxu1  ;;  %v557_v4 = vsel %vm324_vm6, %v552_v62, -inf }
 0x710   :  { %558 = vmax.xlane.f32.xlu1 %v557_v4  ;;  %v2063_v4 = vld [vmem:[#allocation6 + $0xb8] ss:$0 sm:$0xff] }
 0x714   :  { %v662_v5 = vpop.f32.mrb[20].mxu1 }
 0x715   :  { %v663_v6 = vadd.f32 %v662_v5, %v2789_v60  ;;  %v2286_v7 = vpop.f32.mrb[21].mxu1 }
 0x716   :  { %v665_v8 = vpop.f32.mrb[22].mxu1 }
 0x717   :  { %v2287_v9 = vpop.f32.mrb[23].mxu1  ;;  %v668_v11 = vsel %vm324_vm6, %v663_v6, -inf }
 0x718   :  { %669 = vmax.xlane.f32.xlu0 %v668_v11 }
 0x721   :  { %449 = vrot.lane.b32.xlu1 %v2724_v10, %s2642_s22 }
 0x795   :  { %v439_v12 = vpop.xlane.xlu0 %438 }
 0x796   :  { %v440_v13 = vsub.f32 %v432_v55, %v439_v12 }
 0x798   :  { %v441_v14 = vmul.f32 1.442695, %v440_v13 }
 0x79a   :  { %2503 = vpow2.f32 %v441_v14 }
 0x79d   :  { %v559_v15 = vpop.xlane.xlu1 %558 }
 0x79e   :  { %v560_v16 = vsub.f32 %v552_v62, %v559_v15 }
 0x7a0   :  { %v561_v17 = vmul.f32 1.442695, %v560_v16 }
 0x7a1   :  { %v450_v18 = vpop.permute.xlu1 %449 }
 0x7a2   :  { %2505 = vpow2.f32 %v561_v17  ;;  %v455_v19 = vsel %vm342_vm5, %v450_v18, 0 }
 0x7a3   :  { %2265 = vmatpush3.bf16.msra.mxu0 %v455_v19 }
 0x7a4   :  { %v2504_v20 = vpop.eup %2503  ;;  %2276 = vmatprep.subr.bf16.mxu0 %v2637_v50 }
 0x7a5   :  { %v670_v21 = vpop.xlane.xlu0 %669  ;;  %v443_v22 = vsel %vm324_vm6, %v2504_v20, 0.0 }
 0x7a6   :  { %v671_v24 = vsub.f32 %v663_v6, %v670_v21  ;;  %444 = vadd.xlane.f32.xlu0 %v443_v22 }
 0x7a8   :  { %v672_v10 = vmul.f32 1.442695, %v671_v24 }
 0x7aa   :  { %2507 = vpow2.f32 %v672_v10 }
 0x7ac   :  { %v2506_v25 = vpop.eup %2505 }
 0x7ad   :  { %v563_v26 = vsel %vm324_vm6, %v2506_v25, 0.0 }
 0x7ae   :  { %564 = vadd.xlane.f32.xlu1 %v563_v26 }
 0x7b4   :  { %v2508_v28 = vpop.eup %2507 }
 0x7b5   :  { %v674_v29 = vsel %vm324_vm6, %v2508_v28, 0.0 }
 0x7b6   :  { %675 = vadd.xlane.f32.xlu0 %v674_v29 }
 0x7bf   :  { %680 = vrot.lane.b32.xlu1 %v2757_v35, %s2642_s22 }
 0x7cc   :  { %569 = vrot.lane.b32.xlu0 %v2757_v35, %s2630_s25 }
 0x833   :  { %v445_v30 = vpop.xlane.xlu0 %444 }
 0x834   :  { %2509 = vrcp.f32 %v445_v30 }
 0x83b   :  { %v565_v27 = vpop.xlane.xlu1 %564 }
 0x83c   :  { %2511 = vrcp.f32 %v565_v27 }
 0x83e   :  { %v2510_v31 = vpop.eup %2509 }
 0x83f   :  { %v447_v32 = vmul.f32 %v2510_v31, %v2504_v20  ;;  %v681_v35 = vpop.permute.xlu1 %680 }
 0x840   :  { %v686_v41 = vsel %vm342_vm5, %v681_v35, 0 }
 0x841   :  { %v448_v33 = vpack.c.bf16 %v447_v32, %v447_v32 }
 0x843   :  { %2267 = vmatmul.mubr.msk.bf16.vlgmr.msra.gmra.mrb[4].mxu0 %vm324_vm6, %v448_v33  ;;  %v676_v34 = vpop.xlane.xlu0 %675  ;;  %v2067_v33 = vld [vmem:[#allocation6 + $0xc0] ss:$0 sm:$0xff] }
 0x844   :  { %2513 = vrcp.f32 %v676_v34  ;;  %2278 = vmatprep.mubr.msk.bf16.mxu0 %vm2638_vm3, %v2637_v50 }
 0x846   :  { %v2512_v36 = vpop.eup %2511 }
 0x847   :  { %v567_v37 = vmul.f32 %v2512_v36, %v2506_v25  ;;  %v570_v38 = vpop.permute.xlu0 %569  ;;  %v2475_v25 = vld [vmem:[#allocation3 + $0x20] sm:$0xff]  }
 0x848   :  { %v575_v39 = vsel %vm342_vm5, %v570_v38, 0 }
 0x849   :  { %2277 = vmatpush3.bf16.msra.mxu0 %v575_v39  ;;  %v568_v40 = vpack.c.bf16 %v567_v37, %v567_v37  ;;  %v2068_v39 = vld [vmem:[#allocation6 + $0xc8] ss:$0 sm:$0xff] }
 0x84a   :  { %2288 = vmatprep.subr.bf16.mxu0 %v2637_v50 }
 0x84c   :  { %2279 = vmatmul.mubr.msk.bf16.vlgmr.msra.gmra.mrb[8].mxu0 %vm324_vm6, %v568_v40 }
 0x84d   :  { %2289 = vmatpush3.bf16.msra.mxu0 %v686_v41  ;;  %2290 = vmatprep.mubr.msk.bf16.mxu0 %vm2638_vm3, %v2637_v50 }
 0x84e   :  { %v2514_v42 = vpop.eup %2513  ;;  %2302 = vmatprep.subr.bf16.mxu0 %v2637_v50 }
 0x84f   :  { %v678_v43 = vmul.f32 %v2514_v42, %v2508_v28 }
 0x851   :  { %v679_v44 = vpack.c.bf16 %v678_v43, %v678_v43  ;;  %v2477_v43 = vld [vmem:[#allocation3 + $0x30] sm:$0xff]  }
 0x854   :  { %2291 = vmatmul.mubr.msk.bf16.vlgmr.msra.gmra.mrb[12].mxu0 %vm324_vm6, %v679_v44  ;;  %v2478_v44 = vld [vmem:[#allocation3 + $0x38] sm:$0xff]  }
 0x855   :  { %2306 = vmatprep.mubr.msk.bf16.mxu0 %vm2638_vm3, %v2637_v50  ;;  %2303 = vmatpush3.bf16.msra.mxu0 %v2475_v25 }
 0x856   :  { %2304 = vmatprep.subr.bf16.mxu0 %v2637_v50 }
 0x916   :  { %v491_v45 = vpop.f32.mrb[4].mxu0 }
 0x917   :  { %498 = vrot.lane.b32.xlu1 %v491_v45, %s2643_s23  ;;  %v2268_v46 = vpop.f32.mrb[5].mxu0  ;;  %v2479_v45 = vld [vmem:[#allocation3 + $0x40] sm:$0xff]  }
 0x918   :  { %v494_v47 = vpop.f32.mrb[6].mxu0  ;;  %v2480_v46 = vld [vmem:[#allocation3 + $0x48] sm:$0xff]  }
 0x919   :  { %v2269_v48 = vpop.f32.mrb[7].mxu0  ;;  %v2069_v47 = vld [vmem:[#allocation6 + $0xd0] ss:$0 sm:$0xff] }
 0x91f   :  { %v611_v52 = vpop.f32.mrb[8].mxu0 }
 0x920   :  { %617 = vst.msk [vmem:[#allocation2 + $0x8] sm:$0xff] %vm277_vm4, %v611_v52  ;;  %v2280_v53 = vpop.f32.mrb[9].mxu0 }
 0x921   :  { %v614_v54 = vpop.f32.mrb[10].mxu0 }
 0x922   :  { %v2281_v55 = vpop.f32.mrb[11].mxu0 }
 0x927   :  { %v722_v56 = vpop.f32.mrb[12].mxu0 }
 0x928   :  { %729 = vrot.lane.b32.xlu0 %v722_v56, %s2643_s23  ;;  %v2292_v57 = vpop.f32.mrb[13].mxu0 }
 0x929   :  { %v725_v58 = vpop.f32.mrb[14].mxu0 }
 0x92a   :  { %v2293_v59 = vpop.f32.mrb[15].mxu0 }
 0x989   :  { %v499_v61 = vpop.permute.xlu1 %498 }
 0x98a   :  { %502 = vst.msk [vmem:[#allocation2] sm:$0xff] %vm501_vm7, %v499_v61 }
 0x991   :  { %v733_v63 = vld [vmem:[#allocation2] sm:$0xff] }
 0x99a   :  { %v730_v62 = vpop.permute.xlu0 %729 }
 0x99b   :  { %732 = vst.msk [vmem:[#allocation2 + $0x8] sm:$0xff] %vm501_vm7, %v730_v62 }
 0x9a2   :  { %v734_v0 = vld [vmem:[#allocation2 + $0x8] sm:$0xff] }
 0x9a3   :  { %v739_v1 = vpack.c.bf16 %v734_v0, %v733_v63 }
 0x9a5   :  { %2299 = vmatmul.mubr.msk.bf16.vlgmr.msra.gmra.mrb[24].mxu1 %vm159_vm2, %v739_v1 }
 0x9a6   :  { %2318 = vmatprep.mubr.msk.bf16.mxu1 %vm2638_vm3, %v2637_v50  ;;  %2311 = vmatpush3.bf16.msra.mxu1 %v2477_v43 }
 0x9a7   :  { %2312 = vmatprep.subr.bf16.mxu1 %v2637_v50 }
 0x9aa   :  { %2313 = vmatpush3.bf16.msra.mxu1 %v2478_v44 }
 0x9ab   :  { %2314 = vmatprep.subr.bf16.mxu1 %v2637_v50 }
 0x9ae   :  { %2315 = vmatpush3.bf16.msra.mxu1 %v2479_v45 }
 0x9af   :  { %2316 = vmatprep.subr.bf16.mxu1 %v2637_v50 }
 0x9b2   :  { %2317 = vmatpush3.bf16.msra.mxu1 %v2480_v46 }
 0x9b3   :  { %2336 = vmatprep.subr.bf16.mxu1 %v2637_v50 }
 0xa78   :  { %v794_v5 = vpop.f32.mrb[24].mxu1 }
 0xa79   :  { %v795_v6 = vadd.f32 %v2063_v4, %v794_v5  ;;  %v2300_v7 = vpop.f32.mrb[25].mxu1 }
 0xa7a   :  { %v797_v8 = vpop.f32.mrb[26].mxu1 }
 0xa7b   :  { %v798_v9 = vadd.f32 %v2063_v4, %v797_v8  ;;  %v2301_v11 = vpop.f32.mrb[27].mxu1  ;;  %v801_v12 = vadd.f32 %v795_v6, %v2715_v2 }
 0xa7d   :  { %v805_v13 = vsel %vm159_vm2, %v801_v12, 0.0  ;;  %v802_v14 = vadd.f32 %v798_v9, %v2717_v3  ;;  %v2476_v3 = vld [vmem:[#allocation3 + $0x28] sm:$0xff]  }
 0xa7e   :  { %806 = vadd.xlane.f32.xlu1 %v805_v13  ;;  %2305 = vmatpush3.bf16.msra.mxu0 %v2476_v3 }
 0xa7f   :  { %v808_v15 = vsel %vm159_vm2, %v802_v14, 0.0  ;;  %2322 = vmatprep.subr.bf16.mxu0 %v2637_v50 }
 0xa80   :  { %809 = vadd.xlane.f32.xlu0 %v808_v15 }
 0xb0b   :  { %v807_v16 = vpop.xlane.xlu1 %806 }
 0xb0c   :  { %v811_v17 = vmul.f32 0.03125, %v807_v16 }
 0xb0d   :  { %v810_v18 = vpop.xlane.xlu0 %809 }
 0xb0e   :  { %v813_v19 = vsub.f32 %v801_v12, %v811_v17  ;;  %v812_v20 = vmul.f32 0.03125, %v810_v18 }
 0xb10   :  { %v814_v21 = vsub.f32 %v802_v14, %v812_v20  ;;  %v815_v22 = vmul.f32 %v813_v19, %v813_v19  ;;  %v2073_v14 = vld [vmem:[#allocation6 + $0xd8] ss:$0 sm:$0xff] }
 0xb12   :  { %v817_v24 = vsel %vm159_vm2, %v815_v22, 0.0  ;;  %v816_v10 = vmul.f32 %v814_v21, %v814_v21 }
 0xb13   :  { %818 = vadd.xlane.f32.xlu0 %v817_v24 }
 0xb14   :  { %v820_v2 = vsel %vm159_vm2, %v816_v10, 0.0 }
 0xb15   :  { %821 = vadd.xlane.f32.xlu1 %v820_v2 }
 0xba0   :  { %v819_v26 = vpop.xlane.xlu0 %818 }
 0xba1   :  { %v823_v28 = vmul.f32 0.03125, %v819_v26 }
 0xba2   :  { %v822_v29 = vpop.xlane.xlu1 %821 }
 0xba3   :  { %v825_v30 = vadd.f32 1e-12, %v823_v28  ;;  %v824_v27 = vmul.f32 0.03125, %v822_v29 }
 0xba5   :  { %2515 = vrsqrt.f32 %v825_v30  ;;  %v826_v31 = vadd.f32 1e-12, %v824_v27 }
 0xba7   :  { %2517 = vrsqrt.f32 %v826_v31 }
 0xbaf   :  { %v2516_v32 = vpop.eup %2515 }
 0xbb0   :  { %v829_v34 = vmul.f32 %v2516_v32, %v813_v19 }
 0xbb1   :  { %v2518_v36 = vpop.eup %2517 }
 0xbb2   :  { %v835_v37 = vmul.f32 %v2067_v33, %v829_v34  ;;  %v830_v38 = vmul.f32 %v2518_v36, %v814_v21  ;;  %v2482_v34 = vld [vmem:[#allocation3 + $0x58] sm:$0xff]  }
 0xbb4   :  { %v836_v35 = vmul.f32 %v2067_v33, %v830_v38  ;;  %v841_v40 = vadd.f32 %v2068_v39, %v835_v37  ;;  %v2481_v33 = vld [vmem:[#allocation3 + $0x50] sm:$0xff]  }
 0xbb6   :  { %v842_v41 = vadd.f32 %v2068_v39, %v836_v35 }
 0xbb8   :  { %v847_v42 = vpack.c.bf16 %v842_v41, %v841_v40 }
 0xbba   :  { %2307 = vmatmul.mubr.msk.bf16.vlgmr.msra.gmra.mrb[16].mxu0 %vm159_vm2, %v847_v42  ;;  %v2079_v42 = vld [vmem:[#allocation6 + $0xe0] ss:$0 sm:$0xff] }
 0xbbb   :  { %2326 = vmatprep.mubr.msk.bf16.mxu0 %vm2638_vm3, %v2637_v50  ;;  %2323 = vmatpush3.bf16.msra.mxu0 %v2481_v33 }
 0xbbc   :  { %2324 = vmatprep.subr.bf16.mxu0 %v2637_v50 }
 0xbbf   :  { %2325 = vmatpush3.bf16.msra.mxu0 %v2482_v34 }
 0xbc0   :  { %2330 = vmatprep.subr.bf16.mxu0 %v2637_v50 }
 0xc8d   :  { %v902_v48 = vpop.f32.mrb[16].mxu0 }
 0xc8e   :  { %v903_v49 = vadd.f32 %v2069_v47, %v902_v48  ;;  %v2308_v51 = vpop.f32.mrb[17].mxu0 }
 0xc8f   :  { %v905_v52 = vpop.f32.mrb[18].mxu0 }
 0xc90   :  { %v911_v53 = vmul.f32 0.044715, %v903_v49  ;;  %v906_v54 = vadd.f32 %v2069_v47, %v905_v52  ;;  %v2309_v55 = vpop.f32.mrb[19].mxu0  ;;  %v909_v7 = vmul.f32 0.5, %v903_v49  ;;  %v2080_v47 = vld [vmem:[#allocation6 + $0xe8] ss:$0 sm:$0xff] }
 0xc92   :  { %v913_v56 = vmul.f32 %v911_v53, %v903_v49  ;;  %v912_v57 = vmul.f32 0.044715, %v906_v54  ;;  %v910_v8 = vmul.f32 0.5, %v906_v54  ;;  %v2081_v53 = vld [vmem:[#allocation6 + $0xf0] ss:$0 sm:$0xff] }
 0xc94   :  { %v915_v58 = vmul.f32 %v913_v56, %v903_v49  ;;  %v914_v59 = vmul.f32 %v912_v57, %v906_v54 }
 0xc96   :  { %v917_v61 = vadd.f32 %v915_v58, %v903_v49  ;;  %v916_v62 = vmul.f32 %v914_v59, %v906_v54 }
 0xc98   :  { %v919_v63 = vmul.f32 0.7978846, %v917_v61  ;;  %v918_v0 = vadd.f32 %v916_v62, %v906_v54 }
 0xc9a   :  { %2519 = vtanh.f32 %v919_v63  ;;  %v920_v1 = vmul.f32 0.7978846, %v918_v0 }
 0xc9c   :  { %2521 = vtanh.f32 %v920_v1 }
 0xca4   :  { %v2520_v4 = vpop.eup %2519 }
 0xca5   :  { %v923_v5 = vadd.f32 1.0, %v2520_v4 }
 0xca6   :  { %v2522_v6 = vpop.eup %2521 }
 0xca7   :  { %v924_v9 = vadd.f32 1.0, %v2522_v6  ;;  %v925_v11 = vmul.f32 %v923_v5, %v909_v7 }
 0xca9   :  { %v926_v12 = vmul.f32 %v924_v9, %v910_v8 }
 0xcab   :  { %v935_v13 = vpack.c.bf16 %v926_v12, %v925_v11 }
 0xcad   :  { %2319 = vmatmul.mubr.msk.bf16.vlgmr.msra.gmra.mrb[28].mxu1 %vm965_vm8, %v935_v13 }
 0xcae   :  { %2338 = vmatprep.mubr.msk.bf16.mxu1 %vm2638_vm3, %v2637_v50 }
 0xd80   :  { %v1003_v15 = vpop.f32.mrb[28].mxu1 }
 0xd81   :  { %v1004_v16 = vadd.f32 %v2073_v14, %v1003_v15  ;;  %v2320_v17 = vpop.f32.mrb[29].mxu1 }
 0xd82   :  { %v1006_v18 = vpop.f32.mrb[30].mxu1 }
 0xd83   :  { %v1007_v19 = vadd.f32 %v2073_v14, %v1006_v18  ;;  %v2321_v20 = vpop.f32.mrb[31].mxu1  ;;  %v1010_v21 = vadd.f32 %v1004_v16, %v841_v40 }
 0xd85   :  { %v1014_v22 = vsel %vm159_vm2, %v1010_v21, 0.0  ;;  %v1011_v24 = vadd.f32 %v1007_v19, %v842_v41 }
 0xd86   :  { %1015 = vadd.xlane.f32.xlu0 %v1014_v22 }
 0xd87   :  { %v1017_v10 = vsel %vm159_vm2, %v1011_v24, 0.0 }
 0xd88   :  { %1018 = vadd.xlane.f32.xlu1 %v1017_v10 }
 0xe13   :  { %v1016_v2 = vpop.xlane.xlu0 %1015 }
 0xe14   :  { %v1020_v25 = vmul.f32 0.03125, %v1016_v2 }
 0xe15   :  { %v1019_v3 = vpop.xlane.xlu1 %1018 }
 0xe16   :  { %v1022_v26 = vsub.f32 %v1010_v21, %v1020_v25  ;;  %v1021_v28 = vmul.f32 0.03125, %v1019_v3 }
 0xe18   :  { %v1023_v29 = vsub.f32 %v1011_v24, %v1021_v28  ;;  %v1024_v30 = vmul.f32 %v1022_v26, %v1022_v26 }
 0xe1a   :  { %v1026_v27 = vsel %vm159_vm2, %v1024_v30, 0.0  ;;  %v1025_v31 = vmul.f32 %v1023_v29, %v1023_v29 }
 0xe1b   :  { %1027 = vadd.xlane.f32.xlu0 %v1026_v27 }
 0xe1c   :  { %v1029_v32 = vsel %vm159_vm2, %v1025_v31, 0.0 }
 0xe1d   :  { %1030 = vadd.xlane.f32.xlu1 %v1029_v32 }
 0xea8   :  { %v1028_v36 = vpop.xlane.xlu0 %1027 }
 0xea9   :  { %v1032_v37 = vmul.f32 0.03125, %v1028_v36 }
 0xeaa   :  { %v1031_v38 = vpop.xlane.xlu1 %1030 }
 0xeab   :  { %v1034_v39 = vadd.f32 1e-12, %v1032_v37  ;;  %v1033_v35 = vmul.f32 0.03125, %v1031_v38 }
 0xead   :  { %2523 = vrsqrt.f32 %v1034_v39  ;;  %v1035_v40 = vadd.f32 1e-12, %v1033_v35 }
 0xeaf   :  { %2525 = vrsqrt.f32 %v1035_v40 }
 0xeb7   :  { %v2524_v41 = vpop.eup %2523 }
 0xeb8   :  { %v1038_v43 = vmul.f32 %v2524_v41, %v1022_v26 }
 0xeb9   :  { %v2526_v44 = vpop.eup %2525 }
 0xeba   :  { %v1044_v45 = vmul.f32 %v2079_v42, %v1038_v43  ;;  %v1039_v46 = vmul.f32 %v2526_v44, %v1023_v29 }
 0xebc   :  { %v1045_v48 = vmul.f32 %v2079_v42, %v1039_v46  ;;  %v2853_v49 = vadd.f32 %v2080_v47, %v1044_v45 }
 0xebe   :  { %v2855_v51 = vadd.f32 %v2080_v47, %v1045_v48 }
 0xec0   :  { %v1056_v52 = vpack.c.bf16 %v2855_v51, %v2853_v49 }
 0xec2   :  { %2327 = vmatmul.mubr.msk.bf16.vlgmr.msra.gmra.mrb[20].mxu0 %vm159_vm2, %v1056_v52 }
 0xec3   :  { %2332 = vmatprep.mubr.msk.bf16.mxu0 %vm2638_vm3, %v2637_v50 }
 0xf95   :  { %v1111_v54 = vpop.f32.mrb[20].mxu0 }
 0xf96   :  { %v1112_v55 = vadd.f32 %v2081_v53, %v1111_v54  ;;  %v2328_v56 = vpop.f32.mrb[21].mxu0 }
 0xf97   :  { %v1114_v57 = vpop.f32.mrb[22].mxu0 }
 0xf98   :  { %v2862_v58 = vpack.c.bf16 %v1112_v55, %v1112_v55  ;;  %v1115_v59 = vadd.f32 %v2081_v53, %v1114_v57  ;;  %v2329_v61 = vpop.f32.mrb[23].mxu0 }
 0xf9a   :  { %1231 = vrot.lane.b32.xlu1 %v2862_v58, %s2641_s21  ;;  %1120 = vrot.lane.b32.xlu0 %v2862_v58, %s2639_s0  ;;  %v2868_v62 = vpack.c.bf16 %v1115_v59, %v1115_v59 }
 0xf9e   :  { %1229 = vrot.lane.b32.xlu1 %v2862_v58, %s2640_s1  ;;  %1346 = vrot.lane.b32.xlu0 %v2868_v62, %s2639_s0 }
 0xfa2   :  { %1457 = vrot.lane.b32.xlu1 %v2868_v62, %s2641_s21  ;;  %1455 = vrot.lane.b32.xlu0 %v2868_v62, %s2640_s1 }
0x100c   :  { %v1121_v63 = vpop.permute.xlu0 %1120  ;;  %v1232_v1 = vpop.permute.xlu1 %1231 }
0x100d   :  { %v1126_v0 = vsel %vm277_vm4, %v1121_v63, 0  ;;  %v1237_v4 = vsel %vm277_vm4, %v1232_v1, 0 }
0x100e   :  { %2331 = vmatpush3.bf16.xpose.msra.mxu0 %v1126_v0 }
0x100f   :  { %2342 = vmatprep.subr.bf16.mxu0 %v2637_v50 }
0x1010   :  { %v1347_v5 = vpop.permute.xlu0 %1346  ;;  %v1230_v6 = vpop.permute.xlu1 %1229 }
0x1011   :  { %v1352_v7 = vsel %vm277_vm4, %v1347_v5, 0 }
0x1014   :  { %v1458_v8 = vpop.permute.xlu1 %1457  ;;  %v1456_v11 = vpop.permute.xlu0 %1455 }
0x1015   :  { %2333 = vmatmul.mubr.msk.bf16.vlgmr.msra.gmra.mrb[24].mxu0 %vm277_vm4, %v2862_v58  ;;  %v1463_v9 = vsel %vm277_vm4, %v1458_v8, 0 }
0x1016   :  { %2343 = vmatpush3.bf16.xpose.msra.mxu0 %v1237_v4  ;;  %2344 = vmatprep.mubr.msk.bf16.mxu0 %vm2638_vm3, %v2637_v50 }
0x1017   :  { %2354 = vmatprep.subr.bf16.mxu0 %v2637_v50 }
0x101d   :  { %2345 = vmatmul.mubr.msk.bf16.vlgmr.msra.gmra.mrb[28].mxu0 %vm277_vm4, %v1230_v6 }
0x101e   :  { %2355 = vmatpush3.bf16.xpose.msra.mxu0 %v1352_v7  ;;  %2356 = vmatprep.mubr.msk.bf16.mxu0 %vm2638_vm3, %v2637_v50 }
0x101f   :  { %2366 = vmatprep.subr.bf16.mxu0 %v2637_v50 }
0x1025   :  { %2357 = vmatmul.mubr.msk.bf16.vlgmr.msra.gmra.mrb[32].mxu0 %vm277_vm4, %v2868_v62 }
0x1026   :  { %2367 = vmatpush3.bf16.xpose.msra.mxu0 %v1463_v9  ;;  %2368 = vmatprep.mubr.msk.bf16.mxu0 %vm2638_vm3, %v2637_v50 }
0x1027   :  { %2378 = vmatprep.subr.bf16.mxu0 %v2637_v50 }
0x102d   :  { %2369 = vmatmul.mubr.msk.bf16.vlgmr.msra.gmra.mrb[36].mxu0 %vm277_vm4, %v1456_v11 }
0x102e   :  { %2382 = vmatprep.mubr.msk.bf16.mxu0 %vm2638_vm3, %v2637_v50 }
0x10e8   :  { %v1162_v12 = vpop.f32.mrb[24].mxu0 }
0x10e9   :  { %v1163_v13 = vadd.f32 %v1162_v12, %v2748_v23  ;;  %v2334_v14 = vpop.f32.mrb[25].mxu0 }
0x10ea   :  { %v1165_v15 = vpop.f32.mrb[26].mxu0 }
0x10eb   :  { %v2335_v16 = vpop.f32.mrb[27].mxu0  ;;  %v1168_v17 = vsel %vm324_vm6, %v1163_v13, -inf }
0x10ec   :  { %1169 = vmax.xlane.f32.xlu1 %v1168_v17 }
0x10f0   :  { %v1273_v18 = vpop.f32.mrb[28].mxu0 }
0x10f1   :  { %v1274_v19 = vadd.f32 %v1273_v18, %v2748_v23  ;;  %v2346_v20 = vpop.f32.mrb[29].mxu0 }
0x10f2   :  { %v1276_v21 = vpop.f32.mrb[30].mxu0 }
0x10f3   :  { %v2347_v22 = vpop.f32.mrb[31].mxu0  ;;  %v1279_v24 = vsel %vm324_vm6, %v1274_v19, -inf }
0x10f4   :  { %1280 = vmax.xlane.f32.xlu0 %v1279_v24 }
0x10f8   :  { %v1388_v10 = vpop.f32.mrb[32].mxu0 }
0x10f9   :  { %v1389_v2 = vadd.f32 %v1388_v10, %v2789_v60  ;;  %v2358_v25 = vpop.f32.mrb[33].mxu0 }
0x10fa   :  { %v1391_v3 = vpop.f32.mrb[34].mxu0 }
0x10fb   :  { %v2359_v26 = vpop.f32.mrb[35].mxu0  ;;  %v1394_v28 = vsel %vm324_vm6, %v1389_v2, -inf  ;;  %v2483_v3 = vld [vmem:[#allocation3 + $0x60] sm:$0xff]  }
0x10fc   :  { %1395 = vmax.xlane.f32.xlu0 %v1394_v28  ;;  %2379 = vmatpush3.bf16.msra.mxu0 %v2483_v3  ;;  %v2484_v26 = vld [vmem:[#allocation3 + $0x68] sm:$0xff]  }
0x10fd   :  { %2380 = vmatprep.subr.bf16.mxu0 %v2637_v50 }
0x1100   :  { %v1499_v29 = vpop.f32.mrb[36].mxu0  ;;  %2381 = vmatpush3.bf16.msra.mxu0 %v2484_v26 }
0x1101   :  { %v1500_v30 = vadd.f32 %v1499_v29, %v2789_v60  ;;  %v2370_v27 = vpop.f32.mrb[37].mxu0  ;;  %2394 = vmatprep.subr.bf16.mxu0 %v2637_v50 }
0x1102   :  { %v1502_v23 = vpop.f32.mrb[38].mxu0 }
0x1103   :  { %v2371_v31 = vpop.f32.mrb[39].mxu0  ;;  %v1505_v32 = vsel %vm324_vm6, %v1500_v30, -inf }
0x1104   :  { %1506 = vmax.xlane.f32.xlu1 %v1505_v32 }
0x1179   :  { %v1170_v33 = vpop.xlane.xlu1 %1169 }
0x117a   :  { %v1171_v34 = vsub.f32 %v1163_v13, %v1170_v33 }
0x117c   :  { %v1172_v36 = vmul.f32 1.442695, %v1171_v34 }
0x117e   :  { %2527 = vpow2.f32 %v1172_v36 }
0x1181   :  { %v1281_v37 = vpop.xlane.xlu0 %1280 }
0x1182   :  { %v1282_v38 = vsub.f32 %v1274_v19, %v1281_v37 }
0x1184   :  { %v1283_v39 = vmul.f32 1.442695, %v1282_v38 }
0x1186   :  { %2529 = vpow2.f32 %v1283_v39 }
0x1188   :  { %v2528_v35 = vpop.eup %2527 }
0x1189   :  { %v1396_v40 = vpop.xlane.xlu0 %1395  ;;  %v1174_v41 = vsel %vm324_vm6, %v2528_v35, 0.0 }
0x118a   :  { %v1397_v42 = vsub.f32 %v1389_v2, %v1396_v40  ;;  %1175 = vadd.xlane.f32.xlu0 %v1174_v41 }
0x118c   :  { %v1398_v60 = vmul.f32 1.442695, %v1397_v42 }
0x118e   :  { %2531 = vpow2.f32 %v1398_v60 }
0x1190   :  { %v2530_v43 = vpop.eup %2529 }
0x1191   :  { %v1285_v44 = vsel %vm324_vm6, %v2530_v43, 0.0  ;;  %v1507_v47 = vpop.xlane.xlu1 %1506 }
0x1192   :  { %1286 = vadd.xlane.f32.xlu1 %v1285_v44  ;;  %v1508_v48 = vsub.f32 %v1500_v30, %v1507_v47 }
0x1194   :  { %v1509_v52 = vmul.f32 1.442695, %v1508_v48 }
0x1196   :  { %2533 = vpow2.f32 %v1509_v52 }
0x1198   :  { %v2532_v45 = vpop.eup %2531 }
0x1199   :  { %v1400_v46 = vsel %vm324_vm6, %v2532_v45, 0.0 }
0x119a   :  { %1401 = vadd.xlane.f32.xlu0 %v1400_v46 }
0x11a0   :  { %v2534_v53 = vpop.eup %2533 }
0x11a1   :  { %v1511_v54 = vsel %vm324_vm6, %v2534_v53, 0.0 }
0x11a3   :  { %1291 = vrot.lane.b32.xlu1 %v2862_v58, %s2642_s22 }
0x11b0   :  { %1180 = vrot.lane.b32.xlu0 %v2862_v58, %s2630_s25 }
0x11b4   :  { %1517 = vrot.lane.b32.xlu0 %v2868_v62, %s2642_s22 }
0x11c7   :  { %1512 = vadd.xlane.f32.xlu1 %v1511_v54 }
0x11d8   :  { %1406 = vrot.lane.b32.xlu1 %v2868_v62, %s2630_s25  ;;  %s2035_s25 = sshll.u32 %s2644_s24, 4  ;;  %s2036_s25 = int_to_ptr.vmem [resolvable:$true] %s2035_s25 }
0x11d9   :  { %s2601_s26 = scalar_lea.vmem %s2036_s25, 32  ;;  %p2606_p3 = scmp.lt.s32.totalorder %s2036_s25, %s2036_s25 }
0x11da   :  { %p2602_p2 = scmp.ne.s32.totalorder %s2036_s25, %s2601_s26  ;;  %p2607_p4 = scmp.lt.s32.totalorder %s2601_s26, %s2601_s26 }
0x11dc   :  { %p2608_p5 = por %p2607_p4, %p2606_p3 }
0x11de   :  { %p2609_p6 = pnand %p2608_p5, %p2602_p2 }
0x1217   :  { %v1176_v55 = vpop.xlane.xlu0 %1175 }
0x1218   :  { %2535 = vrcp.f32 %v1176_v55 }
0x121f   :  { %v1287_v56 = vpop.xlane.xlu1 %1286 }
0x1220   :  { %2537 = vrcp.f32 %v1287_v56 }
0x1222   :  { %v2536_v57 = vpop.eup %2535 }
0x1223   :  { %v1178_v58 = vmul.f32 %v2536_v57, %v2528_v35  ;;  %v1292_v0 = vpop.permute.xlu1 %1291  ;;  %v2093_v35 = vld [vmem:[#allocation6 + $0xf8] ss:$0 sm:$0xff] }
0x1224   :  { %v1297_v5 = vsel %vm342_vm5, %v1292_v0, 0 }
0x1225   :  { %v1179_v1 = vpack.c.bf16 %v1178_v58, %v1178_v58 }
0x1227   :  { %v1402_v59 = vpop.xlane.xlu0 %1401 }
0x1228   :  { %2539 = vrcp.f32 %v1402_v59 }
0x122a   :  { %v2538_v4 = vpop.eup %2537 }
0x122b   :  { %v1181_v61 = vpop.permute.xlu0 %1180  ;;  %v1289_v62 = vmul.f32 %v2538_v4, %v2530_v43 }
0x122c   :  { %v1186_v63 = vsel %vm342_vm5, %v1181_v61, 0 }
0x122d   :  { %2337 = vmatpush3.bf16.msra.mxu1 %v1186_v63  ;;  %v1290_v6 = vpack.c.bf16 %v1289_v62, %v1289_v62  ;;  %v2485_v63 = vld [vmem:[#allocation3 + $0x70] sm:$0xff]  }
0x122e   :  { %2348 = vmatprep.subr.bf16.mxu1 %v2637_v50 }
0x122f   :  { %v1518_v13 = vpop.permute.xlu0 %1517 }
0x1230   :  { %2339 = vmatmul.mubr.msk.bf16.vlgmr.msra.gmra.mrb[32].mxu1 %vm324_vm6, %v1179_v1  ;;  %v1523_v15 = vsel %vm342_vm5, %v1518_v13, 0 }
0x1231   :  { %2349 = vmatpush3.bf16.msra.mxu1 %v1297_v5  ;;  %2350 = vmatprep.mubr.msk.bf16.mxu1 %vm2638_vm3, %v2637_v50 }
0x1232   :  { %2360 = vmatprep.subr.bf16.mxu1 %v2637_v50  ;;  %v2540_v7 = vpop.eup %2539 }
0x1233   :  { %v1404_v9 = vmul.f32 %v2540_v7, %v2532_v45 }
0x1235   :  { %v1405_v14 = vpack.c.bf16 %v1404_v9, %v1404_v9 }
0x1238   :  { %2351 = vmatmul.mubr.msk.bf16.vlgmr.msra.gmra.mrb[36].mxu1 %vm324_vm6, %v1290_v6 }
0x1239   :  { %2362 = vmatprep.mubr.msk.bf16.mxu1 %vm2638_vm3, %v2637_v50 }
0x1254   :  { %v1513_v8 = vpop.xlane.xlu1 %1512 }
0x1255   :  { %2541 = vrcp.f32 %v1513_v8  ;;  %v2097_v8 = vld [vmem:[#allocation6 + $0x100] ss:$0 sm:$0xff] }
0x1258   :  { %v1407_v11 = vpop.permute.xlu1 %1406 }
0x1259   :  { %v1412_v12 = vsel %vm342_vm5, %v1407_v11, 0 }
0x125a   :  { %2361 = vmatpush3.bf16.msra.mxu1 %v1412_v12 }
0x125b   :  { %2372 = vmatprep.subr.bf16.mxu1 %v2637_v50 }
0x125d   :  { %2363 = vmatmul.mubr.msk.bf16.vlgmr.msra.gmra.mrb[40].mxu1 %vm324_vm6, %v1405_v14  ;;  %v2098_v14 = vld [vmem:[#allocation6 + $0x108] ss:$0 sm:$0xff] }
0x125e   :  { %2373 = vmatpush3.bf16.msra.mxu1 %v1523_v15  ;;  %2374 = vmatprep.mubr.msk.bf16.mxu1 %vm2638_vm3, %v2637_v50 }
0x125f   :  { %v2542_v16 = vpop.eup %2541  ;;  %2386 = vmatprep.subr.bf16.mxu1 %v2637_v50 }
0x1260   :  { %v1515_v17 = vmul.f32 %v2542_v16, %v2534_v53 }
0x1262   :  { %v1516_v18 = vpack.c.bf16 %v1515_v17, %v1515_v17 }
0x1265   :  { %2375 = vmatmul.mubr.msk.bf16.vlgmr.msra.gmra.mrb[44].mxu1 %vm324_vm6, %v1516_v18 }
0x1266   :  { %2390 = vmatprep.mubr.msk.bf16.mxu1 %vm2638_vm3, %v2637_v50  ;;  %2387 = vmatpush3.bf16.msra.mxu1 %v2485_v63 }
0x1267   :  { %2388 = vmatprep.subr.bf16.mxu1 %v2637_v50 }
0x1303   :  { %v1222_v19 = vpop.f32.mrb[32].mxu1 }
0x1304   :  { %1228 = vst.msk [vmem:[#allocation2] sm:$0xff] %vm277_vm4, %v1222_v19  ;;  %v2340_v20 = vpop.f32.mrb[33].mxu1  ;;  %v2487_v19 = vld [vmem:[#allocation3 + $0x80] sm:$0xff]  }
0x1305   :  { %v1225_v21 = vpop.f32.mrb[34].mxu1  ;;  %v2488_v20 = vld [vmem:[#allocation3 + $0x88] sm:$0xff]  }
0x1306   :  { %v2341_v22 = vpop.f32.mrb[35].mxu1  ;;  %v2489_v21 = vld [vmem:[#allocation3 + $0x90] sm:$0xff]  }
0x1307   :  { %v2490_v22 = vld [vmem:[#allocation3 + $0x98] sm:$0xff]  }
0x130b   :  { %v1333_v24 = vpop.f32.mrb[36].mxu1 }
0x130c   :  { %1340 = vrot.lane.b32.xlu1 %v1333_v24, %s2643_s23  ;;  %v2352_v10 = vpop.f32.mrb[37].mxu1  ;;  %v2099_v24 = vld [vmem:[#allocation6 + $0x110] ss:$0 sm:$0xff] }
0x130d   :  { %v1336_v2 = vpop.f32.mrb[38].mxu1 }
0x130e   :  { %v2353_v25 = vpop.f32.mrb[39].mxu1 }
0x1330   :  { %v1448_v28 = vpop.f32.mrb[40].mxu1 }
0x1331   :  { %1454 = vst.msk [vmem:[#allocation2 + $0x8] sm:$0xff] %vm277_vm4, %v1448_v28  ;;  %v2364_v29 = vpop.f32.mrb[41].mxu1 }
0x1332   :  { %v1451_v30 = vpop.f32.mrb[42].mxu1 }
0x1333   :  { %v2365_v27 = vpop.f32.mrb[43].mxu1 }
0x1338   :  { %v1559_v23 = vpop.f32.mrb[44].mxu1 }
0x1339   :  { %1566 = vrot.lane.b32.xlu0 %v1559_v23, %s2643_s23  ;;  %v2376_v31 = vpop.f32.mrb[45].mxu1 }
0x133a   :  { %v1562_v32 = vpop.f32.mrb[46].mxu1 }
0x133b   :  { %v2377_v33 = vpop.f32.mrb[47].mxu1 }
0x137e   :  { %v1341_v34 = vpop.permute.xlu1 %1340 }
0x137f   :  { %1343 = vst.msk [vmem:[#allocation2] sm:$0xff] %vm501_vm7, %v1341_v34 }
0x1386   :  { %v1570_v37 = vld [vmem:[#allocation2] sm:$0xff] }
0x13ab   :  { %v1567_v36 = vpop.permute.xlu0 %1566 }
0x13ac   :  { %1569 = vst.msk [vmem:[#allocation2 + $0x8] sm:$0xff] %vm501_vm7, %v1567_v36 }
0x13b3   :  { %v1571_v38 = vld [vmem:[#allocation2 + $0x8] sm:$0xff] }
0x13b4   :  { %v1576_v39 = vpack.c.bf16 %v1571_v38, %v1570_v37 }
0x13b6   :  { %2383 = vmatmul.mubr.msk.bf16.vlgmr.msra.gmra.mrb[40].mxu0 %vm159_vm2, %v1576_v39 }
0x13b7   :  { %2402 = vmatprep.mubr.msk.bf16.mxu0 %vm2638_vm3, %v2637_v50  ;;  %2395 = vmatpush3.bf16.msra.mxu0 %v2487_v19  ;;  %v2110_v19 = vld [vmem:[#allocation6 + $0x128] ss:$0 sm:$0xff] }
0x13b8   :  { %2396 = vmatprep.subr.bf16.mxu0 %v2637_v50 }
0x13bb   :  { %2397 = vmatpush3.bf16.msra.mxu0 %v2488_v20 }
0x13bc   :  { %2398 = vmatprep.subr.bf16.mxu0 %v2637_v50 }
0x13bf   :  { %2399 = vmatpush3.bf16.msra.mxu0 %v2489_v21 }
0x13c0   :  { %2400 = vmatprep.subr.bf16.mxu0 %v2637_v50 }
0x13c3   :  { %2401 = vmatpush3.bf16.msra.mxu0 %v2490_v22 }
0x1489   :  { %v1631_v40 = vpop.f32.mrb[40].mxu0 }
0x148a   :  { %v1632_v41 = vadd.f32 %v2093_v35, %v1631_v40  ;;  %v2384_v42 = vpop.f32.mrb[41].mxu0 }
0x148b   :  { %v1634_v60 = vpop.f32.mrb[42].mxu0 }
0x148c   :  { %v1635_v43 = vadd.f32 %v2093_v35, %v1634_v60  ;;  %v2385_v44 = vpop.f32.mrb[43].mxu0  ;;  %v1638_v45 = vadd.f32 %v1632_v41, %v2853_v49 }
0x148e   :  { %v1642_v46 = vsel %vm159_vm2, %v1638_v45, 0.0  ;;  %v1639_v47 = vadd.f32 %v1635_v43, %v2855_v51  ;;  %v2486_v51 = vld [vmem:[#allocation3 + $0x78] sm:$0xff]  }
0x148f   :  { %1643 = vadd.xlane.f32.xlu1 %v1642_v46  ;;  %2389 = vmatpush3.bf16.msra.mxu1 %v2486_v51 }
0x1490   :  { %v1645_v48 = vsel %vm159_vm2, %v1639_v47, 0.0  ;;  %2406 = vmatprep.subr.bf16.mxu1 %v2637_v50 }
0x1491   :  { %1646 = vadd.xlane.f32.xlu0 %v1645_v48 }
0x151c   :  { %v1644_v52 = vpop.xlane.xlu1 %1643 }
0x151d   :  { %v1648_v53 = vmul.f32 0.03125, %v1644_v52 }
0x151e   :  { %v1647_v54 = vpop.xlane.xlu0 %1646 }
0x151f   :  { %v1650_v55 = vsub.f32 %v1638_v45, %v1648_v53  ;;  %v1649_v56 = vmul.f32 0.03125, %v1647_v54  ;;  %v2103_v45 = vld [vmem:[#allocation6 + $0x118] ss:$0 sm:$0xff] }
0x1521   :  { %v1651_v57 = vsub.f32 %v1639_v47, %v1649_v56  ;;  %v1652_v59 = vmul.f32 %v1650_v55, %v1650_v55 }
0x1523   :  { %v1654_v58 = vsel %vm159_vm2, %v1652_v59, 0.0  ;;  %v1653_v61 = vmul.f32 %v1651_v57, %v1651_v57 }
0x1524   :  { %1655 = vadd.xlane.f32.xlu0 %v1654_v58 }
0x1525   :  { %v1657_v49 = vsel %vm159_vm2, %v1653_v61, 0.0 }
0x1526   :  { %1658 = vadd.xlane.f32.xlu1 %v1657_v49 }
0x15b1   :  { %v1656_v0 = vpop.xlane.xlu0 %1655 }
0x15b2   :  { %v1660_v1 = vmul.f32 0.03125, %v1656_v0 }
0x15b3   :  { %v1659_v4 = vpop.xlane.xlu1 %1658 }
0x15b4   :  { %v1662_v5 = vadd.f32 1e-12, %v1660_v1  ;;  %v1661_v62 = vmul.f32 0.03125, %v1659_v4 }
0x15b6   :  { %2543 = vrsqrt.f32 %v1662_v5  ;;  %v1663_v6 = vadd.f32 1e-12, %v1661_v62 }
0x15b8   :  { %2545 = vrsqrt.f32 %v1663_v6  ;;  %v2491_v6 = vld [vmem:[#allocation3 + $0xa0] sm:$0xff]  }
0x15c0   :  { %v2544_v7 = vpop.eup %2543 }
0x15c1   :  { %v1666_v9 = vmul.f32 %v2544_v7, %v1650_v55  ;;  %v2492_v7 = vld [vmem:[#allocation3 + $0xa8] sm:$0xff]  }
0x15c2   :  { %v2546_v11 = vpop.eup %2545 }
0x15c3   :  { %v1672_v12 = vmul.f32 %v2097_v8, %v1666_v9  ;;  %v1667_v13 = vmul.f32 %v2546_v11, %v1651_v57 }
0x15c5   :  { %v1673_v15 = vmul.f32 %v2097_v8, %v1667_v13  ;;  %v1678_v16 = vadd.f32 %v2098_v14, %v1672_v12 }
0x15c7   :  { %v1679_v17 = vadd.f32 %v2098_v14, %v1673_v15 }
0x15c9   :  { %v1684_v18 = vpack.c.bf16 %v1679_v17, %v1678_v16 }
0x15cb   :  { %2391 = vmatmul.mubr.msk.bf16.vlgmr.msra.gmra.mrb[48].mxu1 %vm159_vm2, %v1684_v18 }
0x15cc   :  { %2410 = vmatprep.mubr.msk.bf16.mxu1 %vm2638_vm3, %v2637_v50  ;;  %2407 = vmatpush3.bf16.msra.mxu1 %v2491_v6 }
0x15cd   :  { %2408 = vmatprep.subr.bf16.mxu1 %v2637_v50 }
0x15d0   :  { %2409 = vmatpush3.bf16.msra.mxu1 %v2492_v7 }
0x15d1   :  { %2414 = vmatprep.subr.bf16.mxu1 %v2637_v50 }
0x169e   :  { %v1739_v10 = vpop.f32.mrb[48].mxu1 }
0x169f   :  { %v1740_v2 = vadd.f32 %v2099_v24, %v1739_v10  ;;  %v2392_v25 = vpop.f32.mrb[49].mxu1 }
0x16a0   :  { %v1742_v3 = vpop.f32.mrb[50].mxu1 }
0x16a1   :  { %v1748_v26 = vmul.f32 0.044715, %v1740_v2  ;;  %v1743_v28 = vadd.f32 %v2099_v24, %v1742_v3  ;;  %v2393_v29 = vpop.f32.mrb[51].mxu1  ;;  %v1746_v40 = vmul.f32 0.5, %v1740_v2 }
0x16a3   :  { %v1750_v30 = vmul.f32 %v1748_v26, %v1740_v2  ;;  %v1749_v27 = vmul.f32 0.044715, %v1743_v28  ;;  %v1747_v41 = vmul.f32 0.5, %v1743_v28 }
0x16a5   :  { %v1752_v23 = vmul.f32 %v1750_v30, %v1740_v2  ;;  %v1751_v31 = vmul.f32 %v1749_v27, %v1743_v28  ;;  %v2493_v27 = vld [vmem:[#allocation3 + $0xb0] sm:$0xff]  }
0x16a7   :  { %v1754_v32 = vadd.f32 %v1752_v23, %v1740_v2  ;;  %v1753_v33 = vmul.f32 %v1751_v31, %v1743_v28  ;;  %v2494_v23 = vld [vmem:[#allocation3 + $0xb8] sm:$0xff]   ;;  %v2111_v31 = vld [vmem:[#allocation6 + $0x130] ss:$0 sm:$0xff] }
0x16a9   :  { %v1756_v34 = vmul.f32 0.7978846, %v1754_v32  ;;  %v1755_v36 = vadd.f32 %v1753_v33, %v1743_v28 }
0x16ab   :  { %2547 = vtanh.f32 %v1756_v34  ;;  %v1757_v37 = vmul.f32 0.7978846, %v1755_v36 }
0x16ad   :  { %2549 = vtanh.f32 %v1757_v37 }
0x16b5   :  { %v2548_v38 = vpop.eup %2547 }
0x16b6   :  { %v1760_v39 = vadd.f32 1.0, %v2548_v38 }
0x16b7   :  { %v2550_v35 = vpop.eup %2549 }
0x16b8   :  { %v1761_v42 = vadd.f32 1.0, %v2550_v35  ;;  %v1762_v60 = vmul.f32 %v1760_v39, %v1746_v40  ;;  %v2115_v35 = vld [vmem:[#allocation6 + $0x138] ss:$0 sm:$0xff] }
0x16ba   :  { %v1763_v43 = vmul.f32 %v1761_v42, %v1747_v41 }
0x16bc   :  { %v1772_v44 = vpack.c.bf16 %v1763_v43, %v1762_v60 }
0x16be   :  { %2403 = vmatmul.mubr.msk.bf16.vlgmr.msra.gmra.mrb[44].mxu0 %vm965_vm8, %v1772_v44 }
0x1791   :  { %v1839_v46 = vpop.f32.mrb[44].mxu0 }
0x1792   :  { %v1840_v47 = vadd.f32 %v2103_v45, %v1839_v46  ;;  %v2404_v48 = vpop.f32.mrb[45].mxu0 }
0x1793   :  { %v1842_v52 = vpop.f32.mrb[46].mxu0 }
0x1794   :  { %v1843_v53 = vadd.f32 %v2103_v45, %v1842_v52  ;;  %v2405_v54 = vpop.f32.mrb[47].mxu0  ;;  %v1846_v55 = vadd.f32 %v1840_v47, %v1678_v16  ;;  %v2109_v16 = vld [vmem:[#allocation6 + $0x120] ss:$0 sm:$0xff] }
0x1796   :  { %v1850_v56 = vsel %vm159_vm2, %v1846_v55, 0.0  ;;  %v1847_v57 = vadd.f32 %v1843_v53, %v1679_v17 }
0x1797   :  { %1851 = vadd.xlane.f32.xlu1 %v1850_v56 }
0x1798   :  { %v1853_v59 = vsel %vm159_vm2, %v1847_v57, 0.0 }
0x1799   :  { %1854 = vadd.xlane.f32.xlu0 %v1853_v59 }
0x1824   :  { %v1852_v58 = vpop.xlane.xlu1 %1851 }
0x1825   :  { %v1856_v61 = vmul.f32 0.03125, %v1852_v58 }
0x1826   :  { %v1855_v49 = vpop.xlane.xlu0 %1854 }
0x1827   :  { %v1858_v63 = vsub.f32 %v1846_v55, %v1856_v61  ;;  %v1857_v51 = vmul.f32 0.03125, %v1855_v49 }
0x1829   :  { %v1859_v0 = vsub.f32 %v1847_v57, %v1857_v51  ;;  %v1860_v1 = vmul.f32 %v1858_v63, %v1858_v63 }
0x182b   :  { %v1862_v4 = vsel %vm159_vm2, %v1860_v1, 0.0  ;;  %v1861_v5 = vmul.f32 %v1859_v0, %v1859_v0 }
0x182c   :  { %1863 = vadd.xlane.f32.xlu1 %v1862_v4 }
0x182d   :  { %v1865_v62 = vsel %vm159_vm2, %v1861_v5, 0.0 }
0x182e   :  { %1866 = vadd.xlane.f32.xlu0 %v1865_v62 }
0x18b9   :  { %v1864_v8 = vpop.xlane.xlu1 %1863 }
0x18ba   :  { %v1868_v9 = vmul.f32 0.03125, %v1864_v8 }
0x18bb   :  { %v1867_v11 = vpop.xlane.xlu0 %1866 }
0x18bc   :  { %v1870_v12 = vadd.f32 1e-12, %v1868_v9  ;;  %v1869_v13 = vmul.f32 0.03125, %v1867_v11 }
0x18be   :  { %2551 = vrsqrt.f32 %v1870_v12  ;;  %v1871_v14 = vadd.f32 1e-12, %v1869_v13 }
0x18c0   :  { %2553 = vrsqrt.f32 %v1871_v14 }
0x18c8   :  { %v2552_v15 = vpop.eup %2551 }
0x18c9   :  { %v1874_v17 = vmul.f32 %v2552_v15, %v1858_v63 }
0x18ca   :  { %v2554_v18 = vpop.eup %2553 }
0x18cb   :  { %v1880_v20 = vmul.f32 %v2109_v16, %v1874_v17  ;;  %v1875_v21 = vmul.f32 %v2554_v18, %v1859_v0 }
0x18cd   :  { %v1886_v22 = vadd.f32 %v2110_v19, %v1880_v20  ;;  %v1881_v24 = vmul.f32 %v2109_v16, %v1875_v21 }
0x18cf   :  { %v1887_v10 = vadd.f32 %v2110_v19, %v1881_v24  ;;  %v1892_v2 = vpack.c.bf16 %v1886_v22, %v1886_v22 }
0x18d1   :  { %v1893_v25 = vpack.c.bf16 %v1887_v10, %v1887_v10  ;;  %v1901_v26 = vunpack.c.l.b16 %v1892_v2 }
0x18d3   :  { %v1902_v3 = vunpack.c.l.b16 %v1893_v25 }
0x18d5   :  { %v1903_v28 = vrot.slane %v1902_v3, 7 }
0x18d7   :  { %v1905_v29 = vsel %vm1904_vm9, %v1903_v28, %v1901_v26 }
0x18d8   :  { %v1906_v30 = vpack.c.b16 %v1905_v29, %v1905_v29 }
0x18da   :  { %2411 = vmatmul.mubr.msk.bf16.vlgmr.msra.gmra.mrb[52].mxu1 %vm159_vm2, %v1906_v30 }
0x18db   :  { %2418 = vmatprep.mubr.msk.bf16.mxu1 %vm2638_vm3, %v2637_v50  ;;  %2415 = vmatpush3.bf16.msra.mxu1 %v2493_v27 }
0x18dc   :  { %2416 = vmatprep.subr.bf16.mxu1 %v2637_v50 }
0x18df   :  { %2417 = vmatpush3.bf16.msra.mxu1 %v2494_v23 }
0x19ad   :  { %v1956_v32 = vpop.f32.mrb[52].mxu1 }
0x19ae   :  { %v1957_v33 = vadd.f32 %v2111_v31, %v1956_v32  ;;  %v2412_v34 = vpop.f32.mrb[53].mxu1 }
0x19af   :  { %v1959_v36 = vpop.f32.mrb[54].mxu1 }
0x19b0   :  { %2555 = vtanh.f32 %v1957_v33  ;;  %v2413_v37 = vpop.f32.mrb[55].mxu1 }
0x19ba   :  { %v2556_v38 = vpop.eup %2555 }
0x19bb   :  { %v1967_v39 = vpack.c.bf16 %v2556_v38, %v2556_v38 }
0x19bd   :  { %2419 = vmatmul.mubr.msk.bf16.vlgmr.msra.gmra.mrb[56].mxu1 %vm159_vm2, %v1967_v39 }
0x1a90   :  { %v2022_v40 = vpop.f32.mrb[56].mxu1 }
0x1a91   :  { %v2023_v41 = vadd.f32 %v2115_v35, %v2022_v40  ;;  %v2420_v42 = vpop.f32.mrb[57].mxu1 }
0x1a92   :  { %v2025_v50 = vpop.f32.mrb[58].mxu1 }
0x1a93   :  { %2028 = vst [vmem:[#allocation8] sm:$0x3] %v2023_v41  ;;  %v2421_v60 = vpop.f32.mrb[59].mxu1 }
0x1a94   :  { %2612 = shalt.err (!%p2609_p6)
}
0x1a95   :  { %s2613_s29 = scalar_lea.hbm %s2993_s4, 32 }
0x1a96   :  { %p2614_p7 = scmp.ne.s32.totalorder %s2993_s4, %s2613_s29  ;;  %p2617_p8 = scmp.lt.u32.totalorder %s2613_s29, %s2993_s4 }
0x1a98   :  { %p2619_p9 = pnand %p2617_p8, %p2614_p7 }
0x1a9a   :  { %2622 = shalt.err (!%p2619_p9)
}
0x1a9b   :  { %2038 = dma.vmem_to_hbm [thread:$0]  %s2036_s25, 32, %s2993_s4, [#allocation5]  }
0x1a9c   :  { %2627 = dma.done.wait [#allocation5], 32  }
0x1a9d   :  { %2628 = vsyncadd [#allocation5], 4294967264 }
0x1a9e   :  { %2042 = vsyncpa [#allocation4], 1 }
0x1a9f   :  { %2043 = vsyncpa [#allocation7], 1 }
0x1aa0   :  { %2044 = vsyncpa [#allocation5], 1 }

</bundles_post_ra>
